<compile_context>
chip_gen: v7x
topology: tpu7x:2x2x1
jax: 0.10.0
libtpu: 0.0.40
codegen_flags: <defaults>
</compile_context>

<pallas_src>
import math
import functools

import jax
import jax.numpy as jnp
from jax.experimental import pallas as pl
from jax.experimental.pallas import tpu as pltpu


# --------------------------------------------------------------------------- kernel

def _mha_kernel(q_ref, k_ref, v_ref,
                wq_ref, wk_ref, wv_ref, wo_ref,
                bq_ref, bk_ref, bv_ref, bo_ref,
                o_ref,
                *, n_heads: int, head_dim: int):
    """Fused cross-attention for one block of batch elements.

    Refs (per grid step over batch blocks):
      q_ref : (Bblk, Lq, D)   k_ref/v_ref : (Bblk, Lk, D)
      w*_ref: (D, D) bf16 (Wq pre-scaled by 1/sqrt(head_dim))
      b*_ref: (1, D) f32  (bq pre-scaled by 1/sqrt(head_dim))
      o_ref : (Bblk, Lq, D)
    """
    b_blk, Lq, D = q_ref.shape
    Lk = k_ref.shape[1]

    # Flatten (Bblk, L, D) -> (Bblk*L, D): bigger M tile for the projections.
    q2 = q_ref[...].reshape(b_blk * Lq, D).astype(jnp.bfloat16)
    k2 = k_ref[...].reshape(b_blk * Lk, D).astype(jnp.bfloat16)
    v2 = v_ref[...].reshape(b_blk * Lk, D).astype(jnp.bfloat16)

    # Input projections: bf16 operands, f32 accumulation, dense N = D.
    # Attention scale is already folded into wq/bq -> no per-score multiply below.
    qp = jnp.dot(q2, wq_ref[...], preferred_element_type=jnp.float32) + bq_ref[...]
    kp = jnp.dot(k2, wk_ref[...], preferred_element_type=jnp.float32) + bk_ref[...]
    vp = jnp.dot(v2, wv_ref[...], preferred_element_type=jnp.float32) + bv_ref[...]

    qp = qp.astype(jnp.bfloat16).reshape(b_blk, Lq, D)
    kp = kp.astype(jnp.bfloat16).reshape(b_blk, Lk, D)
    vp = vp.astype(jnp.bfloat16).reshape(b_blk, Lk, D)

    # Per-head scaled dot-product attention (static unrolled head loop; each
    # iteration is a batched contraction with NO explicit transpose).
    ctx_heads = []
    for h in range(n_heads):
        lo = h * head_dim
        hi = lo + head_dim
        qh = qp[:, :, lo:hi]                               # (Bblk, Lq, hd) bf16
        kh = kp[:, :, lo:hi]                               # (Bblk, Lk, hd) bf16
        vh = vp[:, :, lo:hi]                               # (Bblk, Lk, hd) bf16

        s = jnp.einsum("bqd,bkd->bqk", qh, kh,
                       preferred_element_type=jnp.float32)
        s = s - jnp.max(s, axis=-1, keepdims=True)
        p = jnp.exp(s)
        p = p * pl.reciprocal(jnp.sum(p, axis=-1, keepdims=True), approx=True)

        ctx_h = jnp.einsum("bqk,bkd->bqd", p.astype(jnp.bfloat16), vh,
                           preferred_element_type=jnp.float32)
        ctx_heads.append(ctx_h.astype(jnp.bfloat16))

    # Lane-dense (rows, D) context slab -> single dense output projection.
    ctx = jnp.concatenate(ctx_heads, axis=-1).reshape(b_blk * Lq, D)
    out = jnp.dot(ctx, wo_ref[...], preferred_element_type=jnp.float32) + bo_ref[...]
    o_ref[...] = out.reshape(b_blk, Lq, D).astype(o_ref.dtype)


# ----------------------------------------------------------------- sizing heuristics

def _chip_info():
    """(num TensorCores per chip, per-step VMEM cap in bytes)."""
    kind = ""
    try:
        kind = jax.devices()[0].device_kind.lower()
    except Exception:  # pragma: no cover - CPU/interpret fallback
        pass
    if "v7" in kind or "7x" in kind:
        return 2, 48 << 20          # v7x: 2 TCs, 64 MiB physical VMEM -> ~48 MiB cap
    return 1, 100 << 20             # v5e / v6e: 1 TC, 128 MiB physical VMEM


def _act_bytes_per_batch(Lq, Lk, D):
    """Rough per-batch-element VMEM bytes for one grid step."""
    io = 2 * (2 * Lq + 2 * Lk) * D * 4          # double-buffered f32 q/k/v/out blocks
    proj = (Lq + 2 * Lk) * D * 6                # f32 accum + bf16 copies of qp/kp/vp
    attn = 2 * Lq * Lk * 4 + Lq * D * 6         # per-head f32 scores/probs + ctx
    return io + proj + attn


def _weight_bytes(D):
    return 4 * D * D * 2 + 4 * D * 4            # 4x bf16 (D,D) weights + f32 biases


def _pick_batch_block(B, Lq, Lk, D, *, multi_core, vmem_cap):
    """Largest batch block that fits the VMEM budget; on 2-TC chips keep >= 2
    grid steps when B >= 2 so both TensorCores get work."""
    budget = vmem_cap - int(1.5 * _weight_bytes(D)) - (4 << 20)
    budget = max(budget, 1 << 20)
    pb = max(_act_bytes_per_batch(Lq, Lk, D), 1)
    b_blk = max(1, min(B, budget // pb))
    if multi_core and B >= 2:
        b_blk = min(b_blk, max(1, B // 2))
    while B % b_blk:
        b_blk -= 1
    return b_blk


def _vmem_limit_bytes(b_blk, Lq, Lk, D, vmem_cap):
    need = _weight_bytes(D) + b_blk * _act_bytes_per_batch(Lq, Lk, D)
    return int(min(vmem_cap, max(32 << 20, int(1.5 * need) + (2 << 20))))


# ------------------------------------------------------------------------- wrapper

def _build_pallas_call(B, Lq, Lk, D, out_dtype, b_blk, n_heads, head_dim,
                       vmem_limit, single_buffer_weights):
    kernel = functools.partial(_mha_kernel, n_heads=n_heads, head_dim=head_dim)

    q_spec = pl.BlockSpec((b_blk, Lq, D), lambda b: (b, 0, 0))
    kv_spec = pl.BlockSpec((b_blk, Lk, D), lambda b: (b, 0, 0))
    if single_buffer_weights:
        # Constant index_map: fetched once; single buffer halves weight VMEM.
        w_spec = pl.BlockSpec((D, D), lambda b: (0, 0), pipeline_mode=pl.Buffered(1))
        b_spec = pl.BlockSpec((1, D), lambda b: (0, 0), pipeline_mode=pl.Buffered(1))
    else:
        w_spec = pl.BlockSpec((D, D), lambda b: (0, 0))
        b_spec = pl.BlockSpec((1, D), lambda b: (0, 0))

    return pl.pallas_call(
        kernel,
        out_shape=jax.ShapeDtypeStruct((B, Lq, D), out_dtype),
        grid_spec=pltpu.PrefetchScalarGridSpec(
            num_scalar_prefetch=0,
            grid=(B // b_blk,),
            in_specs=[q_spec, kv_spec, kv_spec,
                      w_spec, w_spec, w_spec, w_spec,
                      b_spec, b_spec, b_spec, b_spec],
            out_specs=pl.BlockSpec((b_blk, Lq, D), lambda b: (b, 0, 0)),
        ),
        compiler_params=pltpu.CompilerParams(
            dimension_semantics=("parallel",),
            vmem_limit_bytes=vmem_limit),
    )


def prepare_params(params, *, n_heads):
    """One-time parameter prep (do NOT call per forward):
       * cast projection weights to bf16 (MXU-native, half the HBM/VMEM traffic),
       * fold the 1/sqrt(head_dim) attention scale into Wq and bq."""
    d_model = params["wq"].shape[0]
    scale = 1.0 / math.sqrt(d_model // n_heads)
    return {
        "wq": (params["wq"] * scale).astype(jnp.bfloat16),
        "wk": params["wk"].astype(jnp.bfloat16),
        "wv": params["wv"].astype(jnp.bfloat16),
        "wo": params["wo"].astype(jnp.bfloat16),
        "bq": (params["bq"] * scale).astype(jnp.float32),
        "bk": params["bk"].astype(jnp.float32),
        "bv": params["bv"].astype(jnp.float32),
        "bo": params["bo"].astype(jnp.float32),
    }


def cross_attention(query, key, value, prepared, *, n_heads: int):
    """query: (B, Lq, D); key/value: (B, Lk, D). `prepared` from prepare_params().
    Returns (B, Lq, D) in query.dtype."""
    B, Lq, D = query.shape
    _, Lk, _ = key.shape
    head_dim = D // n_heads

    n_cores, vmem_cap = _chip_info()
    b_blk = _pick_batch_block(B, Lq, Lk, D, multi_core=(n_cores > 1),
                              vmem_cap=vmem_cap)
    vmem_limit = _vmem_limit_bytes(b_blk, Lq, Lk, D, vmem_cap)

    args = (query, key, value,
            prepared["wq"], prepared["wk"], prepared["wv"], prepared["wo"],
            prepared["bq"], prepared["bk"], prepared["bv"], prepared["bo"])

    try:
        fn = _build_pallas_call(B, Lq, Lk, D, query.dtype, b_blk, n_heads,
                                head_dim, vmem_limit, single_buffer_weights=True)
        return fn(*args)
    except Exception:
        # Fallback if this JAX build rejects pl.Buffered(1) for constant specs.
        fn = _build_pallas_call(B, Lq, Lk, D, query.dtype, b_blk, n_heads,
                                head_dim, vmem_limit, single_buffer_weights=False)
        return fn(*args)


# ----------------------------------------------------------------------- reference

def _reference_mha(query, key, value, params, *, n_heads: int):
    """Pure-JAX f32 reference matching nn.MultiheadAttention (eval mode)."""
    B, Lq, D = query.shape
    Lk = key.shape[1]
    hd = D // n_heads
    q = query @ params["wq"] + params["bq"]
    k = key @ params["wk"] + params["bk"]
    v = value @ params["wv"] + params["bv"]
    q = q.reshape(B, Lq, n_heads, hd).transpose(0, 2, 1, 3)
    k = k.reshape(B, Lk, n_heads, hd).transpose(0, 2, 1, 3)
    v = v.reshape(B, Lk, n_heads, hd).transpose(0, 2, 1, 3)
    s = jnp.einsum("bhqd,bhkd->bhqk", q, k) / math.sqrt(hd)
    p = jax.nn.softmax(s, axis=-1)
    ctx = jnp.einsum("bhqk,bhkd->bhqd", p, v)
    ctx = ctx.transpose(0, 2, 1, 3).reshape(B, Lq, D)
    return ctx @ params["wo"] + params["bo"]


def init_params(key, d_model):
    """Deterministic synthetic weights, shapes per nn.MultiheadAttention:
       in_proj_weight (3D, D) split into Wq/Wk/Wv, out_proj (D, D) + biases.
       Stored pre-transposed as (D_in, D_out) so the kernel does x @ W + b."""
    ks = jax.random.split(key, 4)
    bound = 1.0 / math.sqrt(d_model)
    def mk(k):
        return jax.random.uniform(k, (d_model, d_model), jnp.float32, -bound, bound)
    return {
        "wq": mk(ks[0]), "wk": mk(ks[1]), "wv": mk(ks[2]), "wo": mk(ks[3]),
        "bq": jnp.full((1, d_model), 0.01, jnp.float32),
        "bk": jnp.full((1, d_model), -0.02, jnp.float32),
        "bv": jnp.full((1, d_model), 0.03, jnp.float32),
        "bo": jnp.full((1, d_model), 0.005, jnp.float32),
    }


if __name__ == "__main__":
    B, Lq, Lk = 2, 8, 8
    d_model, n_heads = 32, 4

    root = jax.random.PRNGKey(0)
    kq, kk, kv, kw = jax.random.split(root, 4)
    query = jax.random.normal(kq, (B, Lq, d_model), jnp.float32)
    key_ = jax.random.normal(kk, (B, Lk, d_model), jnp.float32)
    value = jax.random.normal(kv, (B, Lk, d_model), jnp.float32)
    params = init_params(kw, d_model)

    prepared = prepare_params(params, n_heads=n_heads)   # one-time; cache in real use
    out = cross_attention(query, key_, value, prepared, n_heads=n_heads)
    out = jax.block_until_ready(out)

    ref = _reference_mha(query, key_, value, params, n_heads=n_heads)
    assert out.shape == (B, Lq, d_model)
    # bf16 MXU operands vs f32 reference -> bf16-level tolerance.
    assert jnp.allclose(out, ref, atol=5e-2, rtol=5e-2), "mismatch vs reference"

    print("KERNEL_OK")
</pallas_src>

<mosaic_0001>
module attributes {stable_mosaic.version = 11 : i64} {
  func.func @_mha_kernel(%arg0: i32, %arg1: memref<2x8x32xf32, #tpu.memory_space<vmem>>, %arg2: memref<2x8x32xf32, #tpu.memory_space<vmem>>, %arg3: memref<2x8x32xf32, #tpu.memory_space<vmem>>, %arg4: memref<32x32xbf16, #tpu.memory_space<vmem>>, %arg5: memref<32x32xbf16, #tpu.memory_space<vmem>>, %arg6: memref<32x32xbf16, #tpu.memory_space<vmem>>, %arg7: memref<32x32xbf16, #tpu.memory_space<vmem>>, %arg8: memref<1x32xf32, #tpu.memory_space<vmem>>, %arg9: memref<1x32xf32, #tpu.memory_space<vmem>>, %arg10: memref<1x32xf32, #tpu.memory_space<vmem>>, %arg11: memref<1x32xf32, #tpu.memory_space<vmem>>, %arg12: memref<2x8x32xf32, #tpu.memory_space<vmem>>) attributes {dimension_semantics = [#tpu.dimension_semantics<parallel>], iteration_bounds = array<i64: 1>, scalar_prefetch = 0 : i64, scratch_operands = 0 : i64, tpu.core_type = #tpu.core_type<tc>, window_params = [{transform_indices = @transform_0, window_bounds = array<i64: 2, 8, 32>}, {transform_indices = @transform_1, window_bounds = array<i64: 2, 8, 32>}, {transform_indices = @transform_2, window_bounds = array<i64: 2, 8, 32>}, {pipeline_mode = #tpu.pipeline_mode<synchronous>, transform_indices = @transform_3, window_bounds = array<i64: 32, 32>}, {pipeline_mode = #tpu.pipeline_mode<synchronous>, transform_indices = @transform_4, window_bounds = array<i64: 32, 32>}, {pipeline_mode = #tpu.pipeline_mode<synchronous>, transform_indices = @transform_5, window_bounds = array<i64: 32, 32>}, {pipeline_mode = #tpu.pipeline_mode<synchronous>, transform_indices = @transform_6, window_bounds = array<i64: 32, 32>}, {pipeline_mode = #tpu.pipeline_mode<synchronous>, transform_indices = @transform_7, window_bounds = array<i64: 1, 32>}, {pipeline_mode = #tpu.pipeline_mode<synchronous>, transform_indices = @transform_8, window_bounds = array<i64: 1, 32>}, {pipeline_mode = #tpu.pipeline_mode<synchronous>, transform_indices = @transform_9, window_bounds = array<i64: 1, 32>}, {pipeline_mode = #tpu.pipeline_mode<synchronous>, transform_indices = @transform_10, window_bounds = array<i64: 1, 32>}, {transform_indices = @transform_11, window_bounds = array<i64: 2, 8, 32>}]} {
    %c0 = arith.constant 0 : index
    %c0_0 = arith.constant 0 : index
    %c0_1 = arith.constant 0 : index
    %0 = vector.load %arg1[%c0, %c0_0, %c0_1] : memref<2x8x32xf32, #tpu.memory_space<vmem>>, vector<2x8x32xf32>
    %1 = vector.shape_cast %0 : vector<2x8x32xf32> to vector<16x32xf32>
    %2 = arith.truncf %1 : vector<16x32xf32> to vector<16x32xbf16>
    %c0_2 = arith.constant 0 : index
    %c0_3 = arith.constant 0 : index
    %c0_4 = arith.constant 0 : index
    %3 = vector.load %arg2[%c0_2, %c0_3, %c0_4] : memref<2x8x32xf32, #tpu.memory_space<vmem>>, vector<2x8x32xf32>
    %4 = vector.shape_cast %3 : vector<2x8x32xf32> to vector<16x32xf32>
    %5 = arith.truncf %4 : vector<16x32xf32> to vector<16x32xbf16>
    %c0_5 = arith.constant 0 : index
    %c0_6 = arith.constant 0 : index
    %c0_7 = arith.constant 0 : index
    %6 = vector.load %arg3[%c0_5, %c0_6, %c0_7] : memref<2x8x32xf32, #tpu.memory_space<vmem>>, vector<2x8x32xf32>
    %7 = vector.shape_cast %6 : vector<2x8x32xf32> to vector<16x32xf32>
    %8 = arith.truncf %7 : vector<16x32xf32> to vector<16x32xbf16>
    %c0_8 = arith.constant 0 : index
    %c0_9 = arith.constant 0 : index
    %9 = vector.load %arg4[%c0_8, %c0_9] : memref<32x32xbf16, #tpu.memory_space<vmem>>, vector<32x32xbf16>
    %cst = arith.constant dense<0.000000e+00> : vector<16x32xf32>
    %10 = tpu.matmul %2, %9, %cst {dimension_numbers = #tpu.dot_dimension_numbers<[1], [0], [0], [1], [0, 0, 1, 1], [], []>} : vector<16x32xbf16>, vector<32x32xbf16>, vector<16x32xf32> -> vector<16x32xf32>
    %c0_10 = arith.constant 0 : index
    %c0_11 = arith.constant 0 : index
    %11 = vector.load %arg8[%c0_10, %c0_11] : memref<1x32xf32, #tpu.memory_space<vmem>>, vector<1x32xf32>
    %12 = vector.broadcast %11 : vector<1x32xf32> to vector<16x32xf32>
    %13 = arith.addf %10, %12 : vector<16x32xf32>
    %c0_12 = arith.constant 0 : index
    %c0_13 = arith.constant 0 : index
    %14 = vector.load %arg5[%c0_12, %c0_13] : memref<32x32xbf16, #tpu.memory_space<vmem>>, vector<32x32xbf16>
    %cst_14 = arith.constant dense<0.000000e+00> : vector<16x32xf32>
    %15 = tpu.matmul %5, %14, %cst_14 {dimension_numbers = #tpu.dot_dimension_numbers<[1], [0], [0], [1], [0, 0, 1, 1], [], []>} : vector<16x32xbf16>, vector<32x32xbf16>, vector<16x32xf32> -> vector<16x32xf32>
    %c0_15 = arith.constant 0 : index
    %c0_16 = arith.constant 0 : index
    %16 = vector.load %arg9[%c0_15, %c0_16] : memref<1x32xf32, #tpu.memory_space<vmem>>, vector<1x32xf32>
    %17 = vector.broadcast %16 : vector<1x32xf32> to vector<16x32xf32>
    %18 = arith.addf %15, %17 : vector<16x32xf32>
    %c0_17 = arith.constant 0 : index
    %c0_18 = arith.constant 0 : index
    %19 = vector.load %arg6[%c0_17, %c0_18] : memref<32x32xbf16, #tpu.memory_space<vmem>>, vector<32x32xbf16>
    %cst_19 = arith.constant dense<0.000000e+00> : vector<16x32xf32>
    %20 = tpu.matmul %8, %19, %cst_19 {dimension_numbers = #tpu.dot_dimension_numbers<[1], [0], [0], [1], [0, 0, 1, 1], [], []>} : vector<16x32xbf16>, vector<32x32xbf16>, vector<16x32xf32> -> vector<16x32xf32>
    %c0_20 = arith.constant 0 : index
    %c0_21 = arith.constant 0 : index
    %21 = vector.load %arg10[%c0_20, %c0_21] : memref<1x32xf32, #tpu.memory_space<vmem>>, vector<1x32xf32>
    %22 = vector.broadcast %21 : vector<1x32xf32> to vector<16x32xf32>
    %23 = arith.addf %20, %22 : vector<16x32xf32>
    %24 = arith.truncf %13 : vector<16x32xf32> to vector<16x32xbf16>
    %25 = vector.shape_cast %24 : vector<16x32xbf16> to vector<2x8x32xbf16>
    %26 = arith.truncf %18 : vector<16x32xf32> to vector<16x32xbf16>
    %27 = vector.shape_cast %26 : vector<16x32xbf16> to vector<2x8x32xbf16>
    %28 = arith.truncf %23 : vector<16x32xf32> to vector<16x32xbf16>
    %29 = vector.shape_cast %28 : vector<16x32xbf16> to vector<2x8x32xbf16>
    %30 = vector.extract_strided_slice %25 {offsets = [0, 0, 0], sizes = [2, 8, 8], strides = [1, 1, 1]} : vector<2x8x32xbf16> to vector<2x8x8xbf16>
    %31 = vector.extract_strided_slice %27 {offsets = [0, 0, 0], sizes = [2, 8, 8], strides = [1, 1, 1]} : vector<2x8x32xbf16> to vector<2x8x8xbf16>
    %32 = vector.extract_strided_slice %29 {offsets = [0, 0, 0], sizes = [2, 8, 8], strides = [1, 1, 1]} : vector<2x8x32xbf16> to vector<2x8x8xbf16>
    "tpu.trace_start"() <{level = 10 : i32, message = "bqd,bkd->bqk"}> : () -> ()
    %cst_22 = arith.constant dense<0.000000e+00> : vector<2x8x8xf32>
    %33 = tpu.matmul %30, %31, %cst_22 {dimension_numbers = #tpu.dot_dimension_numbers<[2], [2], [1], [1], [0, 0, 0, 1, 1, 1], [0], [0]>} : vector<2x8x8xbf16>, vector<2x8x8xbf16>, vector<2x8x8xf32> -> vector<2x8x8xf32>
    "tpu.trace_stop"() : () -> ()
    %cst_23 = arith.constant dense<0xFF800000> : vector<2x8xf32>
    %34 = vector.multi_reduction <maximumf>, %33, %cst_23 [2] : vector<2x8x8xf32> to vector<2x8xf32>
    %35 = vector.shape_cast %34 : vector<2x8xf32> to vector<2x8x1xf32>
    %36 = vector.broadcast %35 : vector<2x8x1xf32> to vector<2x8x8xf32>
    %37 = arith.subf %33, %36 : vector<2x8x8xf32>
    %38 = math.exp %37 : vector<2x8x8xf32>
    %cst_24 = arith.constant dense<0.000000e+00> : vector<2x8xf32>
    %39 = vector.multi_reduction <add>, %38, %cst_24 [2] : vector<2x8x8xf32> to vector<2x8xf32>
    %40 = vector.shape_cast %39 : vector<2x8xf32> to vector<2x8x1xf32>
    %41 = tpu.reciprocal %40 {approx = true} : vector<2x8x1xf32> -> vector<2x8x1xf32>
    %42 = vector.broadcast %41 : vector<2x8x1xf32> to vector<2x8x8xf32>
    %43 = arith.mulf %38, %42 : vector<2x8x8xf32>
    %44 = arith.truncf %43 : vector<2x8x8xf32> to vector<2x8x8xbf16>
    "tpu.trace_start"() <{level = 10 : i32, message = "bqk,bkd->bqd"}> : () -> ()
    %cst_25 = arith.constant dense<0.000000e+00> : vector<2x8x8xf32>
    %45 = tpu.matmul %44, %32, %cst_25 {dimension_numbers = #tpu.dot_dimension_numbers<[2], [1], [1], [2], [0, 0, 0, 1, 1, 2], [0], [0]>} : vector<2x8x8xbf16>, vector<2x8x8xbf16>, vector<2x8x8xf32> -> vector<2x8x8xf32>
    "tpu.trace_stop"() : () -> ()
    %46 = arith.truncf %45 : vector<2x8x8xf32> to vector<2x8x8xbf16>
    %47 = vector.extract_strided_slice %25 {offsets = [0, 0, 8], sizes = [2, 8, 8], strides = [1, 1, 1]} : vector<2x8x32xbf16> to vector<2x8x8xbf16>
    %48 = vector.extract_strided_slice %27 {offsets = [0, 0, 8], sizes = [2, 8, 8], strides = [1, 1, 1]} : vector<2x8x32xbf16> to vector<2x8x8xbf16>
    %49 = vector.extract_strided_slice %29 {offsets = [0, 0, 8], sizes = [2, 8, 8], strides = [1, 1, 1]} : vector<2x8x32xbf16> to vector<2x8x8xbf16>
    "tpu.trace_start"() <{level = 10 : i32, message = "bqd,bkd->bqk"}> : () -> ()
    %cst_26 = arith.constant dense<0.000000e+00> : vector<2x8x8xf32>
    %50 = tpu.matmul %47, %48, %cst_26 {dimension_numbers = #tpu.dot_dimension_numbers<[2], [2], [1], [1], [0, 0, 0, 1, 1, 1], [0], [0]>} : vector<2x8x8xbf16>, vector<2x8x8xbf16>, vector<2x8x8xf32> -> vector<2x8x8xf32>
    "tpu.trace_stop"() : () -> ()
    %cst_27 = arith.constant dense<0xFF800000> : vector<2x8xf32>
    %51 = vector.multi_reduction <maximumf>, %50, %cst_27 [2] : vector<2x8x8xf32> to vector<2x8xf32>
    %52 = vector.shape_cast %51 : vector<2x8xf32> to vector<2x8x1xf32>
    %53 = vector.broadcast %52 : vector<2x8x1xf32> to vector<2x8x8xf32>
    %54 = arith.subf %50, %53 : vector<2x8x8xf32>
    %55 = math.exp %54 : vector<2x8x8xf32>
    %cst_28 = arith.constant dense<0.000000e+00> : vector<2x8xf32>
    %56 = vector.multi_reduction <add>, %55, %cst_28 [2] : vector<2x8x8xf32> to vector<2x8xf32>
    %57 = vector.shape_cast %56 : vector<2x8xf32> to vector<2x8x1xf32>
    %58 = tpu.reciprocal %57 {approx = true} : vector<2x8x1xf32> -> vector<2x8x1xf32>
    %59 = vector.broadcast %58 : vector<2x8x1xf32> to vector<2x8x8xf32>
    %60 = arith.mulf %55, %59 : vector<2x8x8xf32>
    %61 = arith.truncf %60 : vector<2x8x8xf32> to vector<2x8x8xbf16>
    "tpu.trace_start"() <{level = 10 : i32, message = "bqk,bkd->bqd"}> : () -> ()
    %cst_29 = arith.constant dense<0.000000e+00> : vector<2x8x8xf32>
    %62 = tpu.matmul %61, %49, %cst_29 {dimension_numbers = #tpu.dot_dimension_numbers<[2], [1], [1], [2], [0, 0, 0, 1, 1, 2], [0], [0]>} : vector<2x8x8xbf16>, vector<2x8x8xbf16>, vector<2x8x8xf32> -> vector<2x8x8xf32>
    "tpu.trace_stop"() : () -> ()
    %63 = arith.truncf %62 : vector<2x8x8xf32> to vector<2x8x8xbf16>
    %64 = vector.extract_strided_slice %25 {offsets = [0, 0, 16], sizes = [2, 8, 8], strides = [1, 1, 1]} : vector<2x8x32xbf16> to vector<2x8x8xbf16>
    %65 = vector.extract_strided_slice %27 {offsets = [0, 0, 16], sizes = [2, 8, 8], strides = [1, 1, 1]} : vector<2x8x32xbf16> to vector<2x8x8xbf16>
    %66 = vector.extract_strided_slice %29 {offsets = [0, 0, 16], sizes = [2, 8, 8], strides = [1, 1, 1]} : vector<2x8x32xbf16> to vector<2x8x8xbf16>
    "tpu.trace_start"() <{level = 10 : i32, message = "bqd,bkd->bqk"}> : () -> ()
    %cst_30 = arith.constant dense<0.000000e+00> : vector<2x8x8xf32>
    %67 = tpu.matmul %64, %65, %cst_30 {dimension_numbers = #tpu.dot_dimension_numbers<[2], [2], [1], [1], [0, 0, 0, 1, 1, 1], [0], [0]>} : vector<2x8x8xbf16>, vector<2x8x8xbf16>, vector<2x8x8xf32> -> vector<2x8x8xf32>
    "tpu.trace_stop"() : () -> ()
    %cst_31 = arith.constant dense<0xFF800000> : vector<2x8xf32>
    %68 = vector.multi_reduction <maximumf>, %67, %cst_31 [2] : vector<2x8x8xf32> to vector<2x8xf32>
    %69 = vector.shape_cast %68 : vector<2x8xf32> to vector<2x8x1xf32>
    %70 = vector.broadcast %69 : vector<2x8x1xf32> to vector<2x8x8xf32>
    %71 = arith.subf %67, %70 : vector<2x8x8xf32>
    %72 = math.exp %71 : vector<2x8x8xf32>
    %cst_32 = arith.constant dense<0.000000e+00> : vector<2x8xf32>
    %73 = vector.multi_reduction <add>, %72, %cst_32 [2] : vector<2x8x8xf32> to vector<2x8xf32>
    %74 = vector.shape_cast %73 : vector<2x8xf32> to vector<2x8x1xf32>
    %75 = tpu.reciprocal %74 {approx = true} : vector<2x8x1xf32> -> vector<2x8x1xf32>
    %76 = vector.broadcast %75 : vector<2x8x1xf32> to vector<2x8x8xf32>
    %77 = arith.mulf %72, %76 : vector<2x8x8xf32>
    %78 = arith.truncf %77 : vector<2x8x8xf32> to vector<2x8x8xbf16>
    "tpu.trace_start"() <{level = 10 : i32, message = "bqk,bkd->bqd"}> : () -> ()
    %cst_33 = arith.constant dense<0.000000e+00> : vector<2x8x8xf32>
    %79 = tpu.matmul %78, %66, %cst_33 {dimension_numbers = #tpu.dot_dimension_numbers<[2], [1], [1], [2], [0, 0, 0, 1, 1, 2], [0], [0]>} : vector<2x8x8xbf16>, vector<2x8x8xbf16>, vector<2x8x8xf32> -> vector<2x8x8xf32>
    "tpu.trace_stop"() : () -> ()
    %80 = arith.truncf %79 : vector<2x8x8xf32> to vector<2x8x8xbf16>
    %81 = vector.extract_strided_slice %25 {offsets = [0, 0, 24], sizes = [2, 8, 8], strides = [1, 1, 1]} : vector<2x8x32xbf16> to vector<2x8x8xbf16>
    %82 = vector.extract_strided_slice %27 {offsets = [0, 0, 24], sizes = [2, 8, 8], strides = [1, 1, 1]} : vector<2x8x32xbf16> to vector<2x8x8xbf16>
    %83 = vector.extract_strided_slice %29 {offsets = [0, 0, 24], sizes = [2, 8, 8], strides = [1, 1, 1]} : vector<2x8x32xbf16> to vector<2x8x8xbf16>
    "tpu.trace_start"() <{level = 10 : i32, message = "bqd,bkd->bqk"}> : () -> ()
    %cst_34 = arith.constant dense<0.000000e+00> : vector<2x8x8xf32>
    %84 = tpu.matmul %81, %82, %cst_34 {dimension_numbers = #tpu.dot_dimension_numbers<[2], [2], [1], [1], [0, 0, 0, 1, 1, 1], [0], [0]>} : vector<2x8x8xbf16>, vector<2x8x8xbf16>, vector<2x8x8xf32> -> vector<2x8x8xf32>
    "tpu.trace_stop"() : () -> ()
    %cst_35 = arith.constant dense<0xFF800000> : vector<2x8xf32>
    %85 = vector.multi_reduction <maximumf>, %84, %cst_35 [2] : vector<2x8x8xf32> to vector<2x8xf32>
    %86 = vector.shape_cast %85 : vector<2x8xf32> to vector<2x8x1xf32>
    %87 = vector.broadcast %86 : vector<2x8x1xf32> to vector<2x8x8xf32>
    %88 = arith.subf %84, %87 : vector<2x8x8xf32>
    %89 = math.exp %88 : vector<2x8x8xf32>
    %cst_36 = arith.constant dense<0.000000e+00> : vector<2x8xf32>
    %90 = vector.multi_reduction <add>, %89, %cst_36 [2] : vector<2x8x8xf32> to vector<2x8xf32>
    %91 = vector.shape_cast %90 : vector<2x8xf32> to vector<2x8x1xf32>
    %92 = tpu.reciprocal %91 {approx = true} : vector<2x8x1xf32> -> vector<2x8x1xf32>
    %93 = vector.broadcast %92 : vector<2x8x1xf32> to vector<2x8x8xf32>
    %94 = arith.mulf %89, %93 : vector<2x8x8xf32>
    %95 = arith.truncf %94 : vector<2x8x8xf32> to vector<2x8x8xbf16>
    "tpu.trace_start"() <{level = 10 : i32, message = "bqk,bkd->bqd"}> : () -> ()
    %cst_37 = arith.constant dense<0.000000e+00> : vector<2x8x8xf32>
    %96 = tpu.matmul %95, %83, %cst_37 {dimension_numbers = #tpu.dot_dimension_numbers<[2], [1], [1], [2], [0, 0, 0, 1, 1, 2], [0], [0]>} : vector<2x8x8xbf16>, vector<2x8x8xbf16>, vector<2x8x8xf32> -> vector<2x8x8xf32>
    "tpu.trace_stop"() : () -> ()
    %97 = arith.truncf %96 : vector<2x8x8xf32> to vector<2x8x8xbf16>
    %98 = tpu.concatenate %46, %63, %80, %97 in 2 : vector<2x8x8xbf16>, vector<2x8x8xbf16>, vector<2x8x8xbf16>, vector<2x8x8xbf16> -> vector<2x8x32xbf16>
    %99 = vector.shape_cast %98 : vector<2x8x32xbf16> to vector<16x32xbf16>
    %c0_38 = arith.constant 0 : index
    %c0_39 = arith.constant 0 : index
    %100 = vector.load %arg7[%c0_38, %c0_39] : memref<32x32xbf16, #tpu.memory_space<vmem>>, vector<32x32xbf16>
    %cst_40 = arith.constant dense<0.000000e+00> : vector<16x32xf32>
    %101 = tpu.matmul %99, %100, %cst_40 {dimension_numbers = #tpu.dot_dimension_numbers<[1], [0], [0], [1], [0, 0, 1, 1], [], []>} : vector<16x32xbf16>, vector<32x32xbf16>, vector<16x32xf32> -> vector<16x32xf32>
    %c0_41 = arith.constant 0 : index
    %c0_42 = arith.constant 0 : index
    %102 = vector.load %arg11[%c0_41, %c0_42] : memref<1x32xf32, #tpu.memory_space<vmem>>, vector<1x32xf32>
    %103 = vector.broadcast %102 : vector<1x32xf32> to vector<16x32xf32>
    %104 = arith.addf %101, %103 : vector<16x32xf32>
    %105 = vector.shape_cast %104 : vector<16x32xf32> to vector<2x8x32xf32>
    %c0_43 = arith.constant 0 : index
    %c0_44 = arith.constant 0 : index
    %c0_45 = arith.constant 0 : index
    %106 = vector.load %arg12[%c0_43, %c0_44, %c0_45] : memref<2x8x32xf32, #tpu.memory_space<vmem>>, vector<2x8x32xf32>
    tpu.vector_store %arg12[%c0_43, %c0_44, %c0_45], %105 {strides = array<i32>} : memref<2x8x32xf32, #tpu.memory_space<vmem>>, vector<2x8x32xf32>,
    return
  }
  func.func @transform_0(%arg0: i32) -> (i32, i32, i32) {
    %c0_i32 = arith.constant 0 : i32
    %c0_i32_0 = arith.constant 0 : i32
    %c0_i32_1 = arith.constant 0 : i32
    return %arg0, %c0_i32, %c0_i32_0 : i32, i32, i32
  }
  func.func @transform_1(%arg0: i32) -> (i32, i32, i32) {
    %c0_i32 = arith.constant 0 : i32
    %c0_i32_0 = arith.constant 0 : i32
    %c0_i32_1 = arith.constant 0 : i32
    return %arg0, %c0_i32, %c0_i32_0 : i32, i32, i32
  }
  func.func @transform_2(%arg0: i32) -> (i32, i32, i32) {
    %c0_i32 = arith.constant 0 : i32
    %c0_i32_0 = arith.constant 0 : i32
    %c0_i32_1 = arith.constant 0 : i32
    return %arg0, %c0_i32, %c0_i32_0 : i32, i32, i32
  }
  func.func @transform_3(%arg0: i32) -> (i32, i32) {
    %c0_i32 = arith.constant 0 : i32
    %c0_i32_0 = arith.constant 0 : i32
    %c0_i32_1 = arith.constant 0 : i32
    return %c0_i32, %c0_i32_0 : i32, i32
  }
  func.func @transform_4(%arg0: i32) -> (i32, i32) {
    %c0_i32 = arith.constant 0 : i32
    %c0_i32_0 = arith.constant 0 : i32
    %c0_i32_1 = arith.constant 0 : i32
    return %c0_i32, %c0_i32_0 : i32, i32
  }
  func.func @transform_5(%arg0: i32) -> (i32, i32) {
    %c0_i32 = arith.constant 0 : i32
    %c0_i32_0 = arith.constant 0 : i32
    %c0_i32_1 = arith.constant 0 : i32
    return %c0_i32, %c0_i32_0 : i32, i32
  }
  func.func @transform_6(%arg0: i32) -> (i32, i32) {
    %c0_i32 = arith.constant 0 : i32
    %c0_i32_0 = arith.constant 0 : i32
    %c0_i32_1 = arith.constant 0 : i32
    return %c0_i32, %c0_i32_0 : i32, i32
  }
  func.func @transform_7(%arg0: i32) -> (i32, i32) {
    %c0_i32 = arith.constant 0 : i32
    %c0_i32_0 = arith.constant 0 : i32
    %c0_i32_1 = arith.constant 0 : i32
    return %c0_i32, %c0_i32_0 : i32, i32
  }
  func.func @transform_8(%arg0: i32) -> (i32, i32) {
    %c0_i32 = arith.constant 0 : i32
    %c0_i32_0 = arith.constant 0 : i32
    %c0_i32_1 = arith.constant 0 : i32
    return %c0_i32, %c0_i32_0 : i32, i32
  }
  func.func @transform_9(%arg0: i32) -> (i32, i32) {
    %c0_i32 = arith.constant 0 : i32
    %c0_i32_0 = arith.constant 0 : i32
    %c0_i32_1 = arith.constant 0 : i32
    return %c0_i32, %c0_i32_0 : i32, i32
  }
  func.func @transform_10(%arg0: i32) -> (i32, i32) {
    %c0_i32 = arith.constant 0 : i32
    %c0_i32_0 = arith.constant 0 : i32
    %c0_i32_1 = arith.constant 0 : i32
    return %c0_i32, %c0_i32_0 : i32, i32
  }
  func.func @transform_11(%arg0: i32) -> (i32, i32, i32) {
    %c0_i32 = arith.constant 0 : i32
    %c0_i32_0 = arith.constant 0 : i32
    %c0_i32_1 = arith.constant 0 : i32
    return %arg0, %c0_i32, %c0_i32_0 : i32, i32, i32
  }
}

module attributes {stable_mosaic.version = 11 : i64} {
  func.func @_mha_kernel(%arg0: i32, %arg1: memref<2x8x32xf32, #tpu.memory_space<vmem>>, %arg2: memref<2x8x32xf32, #tpu.memory_space<vmem>>, %arg3: memref<2x8x32xf32, #tpu.memory_space<vmem>>, %arg4: memref<32x32xbf16, #tpu.memory_space<vmem>>, %arg5: memref<32x32xbf16, #tpu.memory_space<vmem>>, %arg6: memref<32x32xbf16, #tpu.memory_space<vmem>>, %arg7: memref<32x32xbf16, #tpu.memory_space<vmem>>, %arg8: memref<1x32xf32, #tpu.memory_space<vmem>>, %arg9: memref<1x32xf32, #tpu.memory_space<vmem>>, %arg10: memref<1x32xf32, #tpu.memory_space<vmem>>, %arg11: memref<1x32xf32, #tpu.memory_space<vmem>>, %arg12: memref<2x8x32xf32, #tpu.memory_space<vmem>>) attributes {dimension_semantics = [#tpu.dimension_semantics<parallel>], iteration_bounds = array<i64: 1>, scalar_prefetch = 0 : i64, scratch_operands = 0 : i64, tpu.core_type = #tpu.core_type<tc>, window_params = [{transform_indices = @transform_0, window_bounds = array<i64: 2, 8, 32>}, {transform_indices = @transform_1, window_bounds = array<i64: 2, 8, 32>}, {transform_indices = @transform_2, window_bounds = array<i64: 2, 8, 32>}, {pipeline_mode = #tpu.pipeline_mode<synchronous>, transform_indices = @transform_3, window_bounds = array<i64: 32, 32>}, {pipeline_mode = #tpu.pipeline_mode<synchronous>, transform_indices = @transform_4, window_bounds = array<i64: 32, 32>}, {pipeline_mode = #tpu.pipeline_mode<synchronous>, transform_indices = @transform_5, window_bounds = array<i64: 32, 32>}, {pipeline_mode = #tpu.pipeline_mode<synchronous>, transform_indices = @transform_6, window_bounds = array<i64: 32, 32>}, {pipeline_mode = #tpu.pipeline_mode<synchronous>, transform_indices = @transform_7, window_bounds = array<i64: 1, 32>}, {pipeline_mode = #tpu.pipeline_mode<synchronous>, transform_indices = @transform_8, window_bounds = array<i64: 1, 32>}, {pipeline_mode = #tpu.pipeline_mode<synchronous>, transform_indices = @transform_9, window_bounds = array<i64: 1, 32>}, {pipeline_mode = #tpu.pipeline_mode<synchronous>, transform_indices = @transform_10, window_bounds = array<i64: 1, 32>}, {transform_indices = @transform_11, window_bounds = array<i64: 2, 8, 32>}]} {
    %c0 = arith.constant 0 : index
    %c0_0 = arith.constant 0 : index
    %c0_1 = arith.constant 0 : index
    %0 = vector.load %arg1[%c0, %c0_0, %c0_1] : memref<2x8x32xf32, #tpu.memory_space<vmem>>, vector<2x8x32xf32>
    %1 = vector.shape_cast %0 : vector<2x8x32xf32> to vector<16x32xf32>
    %2 = arith.truncf %1 : vector<16x32xf32> to vector<16x32xbf16>
    %c0_2 = arith.constant 0 : index
    %c0_3 = arith.constant 0 : index
    %c0_4 = arith.constant 0 : index
    %3 = vector.load %arg2[%c0_2, %c0_3, %c0_4] : memref<2x8x32xf32, #tpu.memory_space<vmem>>, vector<2x8x32xf32>
    %4 = vector.shape_cast %3 : vector<2x8x32xf32> to vector<16x32xf32>
    %5 = arith.truncf %4 : vector<16x32xf32> to vector<16x32xbf16>
    %c0_5 = arith.constant 0 : index
    %c0_6 = arith.constant 0 : index
    %c0_7 = arith.constant 0 : index
    %6 = vector.load %arg3[%c0_5, %c0_6, %c0_7] : memref<2x8x32xf32, #tpu.memory_space<vmem>>, vector<2x8x32xf32>
    %7 = vector.shape_cast %6 : vector<2x8x32xf32> to vector<16x32xf32>
    %8 = arith.truncf %7 : vector<16x32xf32> to vector<16x32xbf16>
    %c0_8 = arith.constant 0 : index
    %c0_9 = arith.constant 0 : index
    %9 = vector.load %arg4[%c0_8, %c0_9] : memref<32x32xbf16, #tpu.memory_space<vmem>>, vector<32x32xbf16>
    %cst = arith.constant dense<0.000000e+00> : vector<16x32xf32>
    %10 = tpu.matmul %2, %9, %cst {dimension_numbers = #tpu.dot_dimension_numbers<[1], [0], [0], [1], [0, 0, 1, 1], [], []>} : vector<16x32xbf16>, vector<32x32xbf16>, vector<16x32xf32> -> vector<16x32xf32>
    %c0_10 = arith.constant 0 : index
    %c0_11 = arith.constant 0 : index
    %11 = vector.load %arg8[%c0_10, %c0_11] : memref<1x32xf32, #tpu.memory_space<vmem>>, vector<1x32xf32>
    %12 = vector.broadcast %11 : vector<1x32xf32> to vector<16x32xf32>
    %13 = arith.addf %10, %12 : vector<16x32xf32>
    %c0_12 = arith.constant 0 : index
    %c0_13 = arith.constant 0 : index
    %14 = vector.load %arg5[%c0_12, %c0_13] : memref<32x32xbf16, #tpu.memory_space<vmem>>, vector<32x32xbf16>
    %cst_14 = arith.constant dense<0.000000e+00> : vector<16x32xf32>
    %15 = tpu.matmul %5, %14, %cst_14 {dimension_numbers = #tpu.dot_dimension_numbers<[1], [0], [0], [1], [0, 0, 1, 1], [], []>} : vector<16x32xbf16>, vector<32x32xbf16>, vector<16x32xf32> -> vector<16x32xf32>
    %c0_15 = arith.constant 0 : index
    %c0_16 = arith.constant 0 : index
    %16 = vector.load %arg9[%c0_15, %c0_16] : memref<1x32xf32, #tpu.memory_space<vmem>>, vector<1x32xf32>
    %17 = vector.broadcast %16 : vector<1x32xf32> to vector<16x32xf32>
    %18 = arith.addf %15, %17 : vector<16x32xf32>
    %c0_17 = arith.constant 0 : index
    %c0_18 = arith.constant 0 : index
    %19 = vector.load %arg6[%c0_17, %c0_18] : memref<32x32xbf16, #tpu.memory_space<vmem>>, vector<32x32xbf16>
    %cst_19 = arith.constant dense<0.000000e+00> : vector<16x32xf32>
    %20 = tpu.matmul %8, %19, %cst_19 {dimension_numbers = #tpu.dot_dimension_numbers<[1], [0], [0], [1], [0, 0, 1, 1], [], []>} : vector<16x32xbf16>, vector<32x32xbf16>, vector<16x32xf32> -> vector<16x32xf32>
    %c0_20 = arith.constant 0 : index
    %c0_21 = arith.constant 0 : index
    %21 = vector.load %arg10[%c0_20, %c0_21] : memref<1x32xf32, #tpu.memory_space<vmem>>, vector<1x32xf32>
    %22 = vector.broadcast %21 : vector<1x32xf32> to vector<16x32xf32>
    %23 = arith.addf %20, %22 : vector<16x32xf32>
    %24 = arith.truncf %13 : vector<16x32xf32> to vector<16x32xbf16>
    %25 = vector.shape_cast %24 : vector<16x32xbf16> to vector<2x8x32xbf16>
    %26 = arith.truncf %18 : vector<16x32xf32> to vector<16x32xbf16>
    %27 = vector.shape_cast %26 : vector<16x32xbf16> to vector<2x8x32xbf16>
    %28 = arith.truncf %23 : vector<16x32xf32> to vector<16x32xbf16>
    %29 = vector.shape_cast %28 : vector<16x32xbf16> to vector<2x8x32xbf16>
    %30 = vector.extract_strided_slice %25 {offsets = [0, 0, 0], sizes = [2, 8, 8], strides = [1, 1, 1]} : vector<2x8x32xbf16> to vector<2x8x8xbf16>
    %31 = vector.extract_strided_slice %27 {offsets = [0, 0, 0], sizes = [2, 8, 8], strides = [1, 1, 1]} : vector<2x8x32xbf16> to vector<2x8x8xbf16>
    %32 = vector.extract_strided_slice %29 {offsets = [0, 0, 0], sizes = [2, 8, 8], strides = [1, 1, 1]} : vector<2x8x32xbf16> to vector<2x8x8xbf16>
    "tpu.trace_start"() <{level = 10 : i32, message = "bqd,bkd->bqk"}> : () -> ()
    %cst_22 = arith.constant dense<0.000000e+00> : vector<2x8x8xf32>
    %33 = tpu.matmul %30, %31, %cst_22 {dimension_numbers = #tpu.dot_dimension_numbers<[2], [2], [1], [1], [0, 0, 0, 1, 1, 1], [0], [0]>} : vector<2x8x8xbf16>, vector<2x8x8xbf16>, vector<2x8x8xf32> -> vector<2x8x8xf32>
    "tpu.trace_stop"() : () -> ()
    %cst_23 = arith.constant dense<0xFF800000> : vector<2x8xf32>
    %34 = vector.multi_reduction <maximumf>, %33, %cst_23 [2] : vector<2x8x8xf32> to vector<2x8xf32>
    %35 = vector.shape_cast %34 : vector<2x8xf32> to vector<2x8x1xf32>
    %36 = vector.broadcast %35 : vector<2x8x1xf32> to vector<2x8x8xf32>
    %37 = arith.subf %33, %36 : vector<2x8x8xf32>
    %38 = math.exp %37 : vector<2x8x8xf32>
    %cst_24 = arith.constant dense<0.000000e+00> : vector<2x8xf32>
    %39 = vector.multi_reduction <add>, %38, %cst_24 [2] : vector<2x8x8xf32> to vector<2x8xf32>
    %40 = vector.shape_cast %39 : vector<2x8xf32> to vector<2x8x1xf32>
    %41 = tpu.reciprocal %40 {approx = true} : vector<2x8x1xf32> -> vector<2x8x1xf32>
    %42 = vector.broadcast %41 : vector<2x8x1xf32> to vector<2x8x8xf32>
    %43 = arith.mulf %38, %42 : vector<2x8x8xf32>
    %44 = arith.truncf %43 : vector<2x8x8xf32> to vector<2x8x8xbf16>
    "tpu.trace_start"() <{level = 10 : i32, message = "bqk,bkd->bqd"}> : () -> ()
    %cst_25 = arith.constant dense<0.000000e+00> : vector<2x8x8xf32>
    %45 = tpu.matmul %44, %32, %cst_25 {dimension_numbers = #tpu.dot_dimension_numbers<[2], [1], [1], [2], [0, 0, 0, 1, 1, 2], [0], [0]>} : vector<2x8x8xbf16>, vector<2x8x8xbf16>, vector<2x8x8xf32> -> vector<2x8x8xf32>
    "tpu.trace_stop"() : () -> ()
    %46 = arith.truncf %45 : vector<2x8x8xf32> to vector<2x8x8xbf16>
    %47 = vector.extract_strided_slice %25 {offsets = [0, 0, 8], sizes = [2, 8, 8], strides = [1, 1, 1]} : vector<2x8x32xbf16> to vector<2x8x8xbf16>
    %48 = vector.extract_strided_slice %27 {offsets = [0, 0, 8], sizes = [2, 8, 8], strides = [1, 1, 1]} : vector<2x8x32xbf16> to vector<2x8x8xbf16>
    %49 = vector.extract_strided_slice %29 {offsets = [0, 0, 8], sizes = [2, 8, 8], strides = [1, 1, 1]} : vector<2x8x32xbf16> to vector<2x8x8xbf16>
    "tpu.trace_start"() <{level = 10 : i32, message = "bqd,bkd->bqk"}> : () -> ()
    %cst_26 = arith.constant dense<0.000000e+00> : vector<2x8x8xf32>
    %50 = tpu.matmul %47, %48, %cst_26 {dimension_numbers = #tpu.dot_dimension_numbers<[2], [2], [1], [1], [0, 0, 0, 1, 1, 1], [0], [0]>} : vector<2x8x8xbf16>, vector<2x8x8xbf16>, vector<2x8x8xf32> -> vector<2x8x8xf32>
    "tpu.trace_stop"() : () -> ()
    %cst_27 = arith.constant dense<0xFF800000> : vector<2x8xf32>
    %51 = vector.multi_reduction <maximumf>, %50, %cst_27 [2] : vector<2x8x8xf32> to vector<2x8xf32>
    %52 = vector.shape_cast %51 : vector<2x8xf32> to vector<2x8x1xf32>
    %53 = vector.broadcast %52 : vector<2x8x1xf32> to vector<2x8x8xf32>
    %54 = arith.subf %50, %53 : vector<2x8x8xf32>
    %55 = math.exp %54 : vector<2x8x8xf32>
    %cst_28 = arith.constant dense<0.000000e+00> : vector<2x8xf32>
    %56 = vector.multi_reduction <add>, %55, %cst_28 [2] : vector<2x8x8xf32> to vector<2x8xf32>
    %57 = vector.shape_cast %56 : vector<2x8xf32> to vector<2x8x1xf32>
    %58 = tpu.reciprocal %57 {approx = true} : vector<2x8x1xf32> -> vector<2x8x1xf32>
    %59 = vector.broadcast %58 : vector<2x8x1xf32> to vector<2x8x8xf32>
    %60 = arith.mulf %55, %59 : vector<2x8x8xf32>
    %61 = arith.truncf %60 : vector<2x8x8xf32> to vector<2x8x8xbf16>
    "tpu.trace_start"() <{level = 10 : i32, message = "bqk,bkd->bqd"}> : () -> ()
    %cst_29 = arith.constant dense<0.000000e+00> : vector<2x8x8xf32>
    %62 = tpu.matmul %61, %49, %cst_29 {dimension_numbers = #tpu.dot_dimension_numbers<[2], [1], [1], [2], [0, 0, 0, 1, 1, 2], [0], [0]>} : vector<2x8x8xbf16>, vector<2x8x8xbf16>, vector<2x8x8xf32> -> vector<2x8x8xf32>
    "tpu.trace_stop"() : () -> ()
    %63 = arith.truncf %62 : vector<2x8x8xf32> to vector<2x8x8xbf16>
    %64 = vector.extract_strided_slice %25 {offsets = [0, 0, 16], sizes = [2, 8, 8], strides = [1, 1, 1]} : vector<2x8x32xbf16> to vector<2x8x8xbf16>
    %65 = vector.extract_strided_slice %27 {offsets = [0, 0, 16], sizes = [2, 8, 8], strides = [1, 1, 1]} : vector<2x8x32xbf16> to vector<2x8x8xbf16>
    %66 = vector.extract_strided_slice %29 {offsets = [0, 0, 16], sizes = [2, 8, 8], strides = [1, 1, 1]} : vector<2x8x32xbf16> to vector<2x8x8xbf16>
    "tpu.trace_start"() <{level = 10 : i32, message = "bqd,bkd->bqk"}> : () -> ()
    %cst_30 = arith.constant dense<0.000000e+00> : vector<2x8x8xf32>
    %67 = tpu.matmul %64, %65, %cst_30 {dimension_numbers = #tpu.dot_dimension_numbers<[2], [2], [1], [1], [0, 0, 0, 1, 1, 1], [0], [0]>} : vector<2x8x8xbf16>, vector<2x8x8xbf16>, vector<2x8x8xf32> -> vector<2x8x8xf32>
    "tpu.trace_stop"() : () -> ()
    %cst_31 = arith.constant dense<0xFF800000> : vector<2x8xf32>
    %68 = vector.multi_reduction <maximumf>, %67, %cst_31 [2] : vector<2x8x8xf32> to vector<2x8xf32>
    %69 = vector.shape_cast %68 : vector<2x8xf32> to vector<2x8x1xf32>
    %70 = vector.broadcast %69 : vector<2x8x1xf32> to vector<2x8x8xf32>
    %71 = arith.subf %67, %70 : vector<2x8x8xf32>
    %72 = math.exp %71 : vector<2x8x8xf32>
    %cst_32 = arith.constant dense<0.000000e+00> : vector<2x8xf32>
    %73 = vector.multi_reduction <add>, %72, %cst_32 [2] : vector<2x8x8xf32> to vector<2x8xf32>
    %74 = vector.shape_cast %73 : vector<2x8xf32> to vector<2x8x1xf32>
    %75 = tpu.reciprocal %74 {approx = true} : vector<2x8x1xf32> -> vector<2x8x1xf32>
    %76 = vector.broadcast %75 : vector<2x8x1xf32> to vector<2x8x8xf32>
    %77 = arith.mulf %72, %76 : vector<2x8x8xf32>
    %78 = arith.truncf %77 : vector<2x8x8xf32> to vector<2x8x8xbf16>
    "tpu.trace_start"() <{level = 10 : i32, message = "bqk,bkd->bqd"}> : () -> ()
    %cst_33 = arith.constant dense<0.000000e+00> : vector<2x8x8xf32>
    %79 = tpu.matmul %78, %66, %cst_33 {dimension_numbers = #tpu.dot_dimension_numbers<[2], [1], [1], [2], [0, 0, 0, 1, 1, 2], [0], [0]>} : vector<2x8x8xbf16>, vector<2x8x8xbf16>, vector<2x8x8xf32> -> vector<2x8x8xf32>
    "tpu.trace_stop"() : () -> ()
    %80 = arith.truncf %79 : vector<2x8x8xf32> to vector<2x8x8xbf16>
    %81 = vector.extract_strided_slice %25 {offsets = [0, 0, 24], sizes = [2, 8, 8], strides = [1, 1, 1]} : vector<2x8x32xbf16> to vector<2x8x8xbf16>
    %82 = vector.extract_strided_slice %27 {offsets = [0, 0, 24], sizes = [2, 8, 8], strides = [1, 1, 1]} : vector<2x8x32xbf16> to vector<2x8x8xbf16>
    %83 = vector.extract_strided_slice %29 {offsets = [0, 0, 24], sizes = [2, 8, 8], strides = [1, 1, 1]} : vector<2x8x32xbf16> to vector<2x8x8xbf16>
    "tpu.trace_start"() <{level = 10 : i32, message = "bqd,bkd->bqk"}> : () -> ()
    %cst_34 = arith.constant dense<0.000000e+00> : vector<2x8x8xf32>
    %84 = tpu.matmul %81, %82, %cst_34 {dimension_numbers = #tpu.dot_dimension_numbers<[2], [2], [1], [1], [0, 0, 0, 1, 1, 1], [0], [0]>} : vector<2x8x8xbf16>, vector<2x8x8xbf16>, vector<2x8x8xf32> -> vector<2x8x8xf32>
    "tpu.trace_stop"() : () -> ()
    %cst_35 = arith.constant dense<0xFF800000> : vector<2x8xf32>
    %85 = vector.multi_reduction <maximumf>, %84, %cst_35 [2] : vector<2x8x8xf32> to vector<2x8xf32>
    %86 = vector.shape_cast %85 : vector<2x8xf32> to vector<2x8x1xf32>
    %87 = vector.broadcast %86 : vector<2x8x1xf32> to vector<2x8x8xf32>
    %88 = arith.subf %84, %87 : vector<2x8x8xf32>
    %89 = math.exp %88 : vector<2x8x8xf32>
    %cst_36 = arith.constant dense<0.000000e+00> : vector<2x8xf32>
    %90 = vector.multi_reduction <add>, %89, %cst_36 [2] : vector<2x8x8xf32> to vector<2x8xf32>
    %91 = vector.shape_cast %90 : vector<2x8xf32> to vector<2x8x1xf32>
    %92 = tpu.reciprocal %91 {approx = true} : vector<2x8x1xf32> -> vector<2x8x1xf32>
    %93 = vector.broadcast %92 : vector<2x8x1xf32> to vector<2x8x8xf32>
    %94 = arith.mulf %89, %93 : vector<2x8x8xf32>
    %95 = arith.truncf %94 : vector<2x8x8xf32> to vector<2x8x8xbf16>
    "tpu.trace_start"() <{level = 10 : i32, message = "bqk,bkd->bqd"}> : () -> ()
    %cst_37 = arith.constant dense<0.000000e+00> : vector<2x8x8xf32>
    %96 = tpu.matmul %95, %83, %cst_37 {dimension_numbers = #tpu.dot_dimension_numbers<[2], [1], [1], [2], [0, 0, 0, 1, 1, 2], [0], [0]>} : vector<2x8x8xbf16>, vector<2x8x8xbf16>, vector<2x8x8xf32> -> vector<2x8x8xf32>
    "tpu.trace_stop"() : () -> ()
    %97 = arith.truncf %96 : vector<2x8x8xf32> to vector<2x8x8xbf16>
    %98 = tpu.concatenate %46, %63, %80, %97 in 2 : vector<2x8x8xbf16>, vector<2x8x8xbf16>, vector<2x8x8xbf16>, vector<2x8x8xbf16> -> vector<2x8x32xbf16>
    %99 = vector.shape_cast %98 : vector<2x8x32xbf16> to vector<16x32xbf16>
    %c0_38 = arith.constant 0 : index
    %c0_39 = arith.constant 0 : index
    %100 = vector.load %arg7[%c0_38, %c0_39] : memref<32x32xbf16, #tpu.memory_space<vmem>>, vector<32x32xbf16>
    %cst_40 = arith.constant dense<0.000000e+00> : vector<16x32xf32>
    %101 = tpu.matmul %99, %100, %cst_40 {dimension_numbers = #tpu.dot_dimension_numbers<[1], [0], [0], [1], [0, 0, 1, 1], [], []>} : vector<16x32xbf16>, vector<32x32xbf16>, vector<16x32xf32> -> vector<16x32xf32>
    %c0_41 = arith.constant 0 : index
    %c0_42 = arith.constant 0 : index
    %102 = vector.load %arg11[%c0_41, %c0_42] : memref<1x32xf32, #tpu.memory_space<vmem>>, vector<1x32xf32>
    %103 = vector.broadcast %102 : vector<1x32xf32> to vector<16x32xf32>
    %104 = arith.addf %101, %103 : vector<16x32xf32>
    %105 = vector.shape_cast %104 : vector<16x32xf32> to vector<2x8x32xf32>
    %c0_43 = arith.constant 0 : index
    %c0_44 = arith.constant 0 : index
    %c0_45 = arith.constant 0 : index
    %106 = vector.load %arg12[%c0_43, %c0_44, %c0_45] : memref<2x8x32xf32, #tpu.memory_space<vmem>>, vector<2x8x32xf32>
    tpu.vector_store %arg12[%c0_43, %c0_44, %c0_45], %105 {strides = array<i32>} : memref<2x8x32xf32, #tpu.memory_space<vmem>>, vector<2x8x32xf32>,
    return
  }
  func.func @transform_0(%arg0: i32) -> (i32, i32, i32) {
    %c0_i32 = arith.constant 0 : i32
    %c0_i32_0 = arith.constant 0 : i32
    %c0_i32_1 = arith.constant 0 : i32
    return %arg0, %c0_i32, %c0_i32_0 : i32, i32, i32
  }
  func.func @transform_1(%arg0: i32) -> (i32, i32, i32) {
    %c0_i32 = arith.constant 0 : i32
    %c0_i32_0 = arith.constant 0 : i32
    %c0_i32_1 = arith.constant 0 : i32
    return %arg0, %c0_i32, %c0_i32_0 : i32, i32, i32
  }
  func.func @transform_2(%arg0: i32) -> (i32, i32, i32) {
    %c0_i32 = arith.constant 0 : i32
    %c0_i32_0 = arith.constant 0 : i32
    %c0_i32_1 = arith.constant 0 : i32
    return %arg0, %c0_i32, %c0_i32_0 : i32, i32, i32
  }
  func.func @transform_3(%arg0: i32) -> (i32, i32) {
    %c0_i32 = arith.constant 0 : i32
    %c0_i32_0 = arith.constant 0 : i32
    %c0_i32_1 = arith.constant 0 : i32
    return %c0_i32, %c0_i32_0 : i32, i32
  }
  func.func @transform_4(%arg0: i32) -> (i32, i32) {
    %c0_i32 = arith.constant 0 : i32
    %c0_i32_0 = arith.constant 0 : i32
    %c0_i32_1 = arith.constant 0 : i32
    return %c0_i32, %c0_i32_0 : i32, i32
  }
  func.func @transform_5(%arg0: i32) -> (i32, i32) {
    %c0_i32 = arith.constant 0 : i32
    %c0_i32_0 = arith.constant 0 : i32
    %c0_i32_1 = arith.constant 0 : i32
    return %c0_i32, %c0_i32_0 : i32, i32
  }
  func.func @transform_6(%arg0: i32) -> (i32, i32) {
    %c0_i32 = arith.constant 0 : i32
    %c0_i32_0 = arith.constant 0 : i32
    %c0_i32_1 = arith.constant 0 : i32
    return %c0_i32, %c0_i32_0 : i32, i32
  }
  func.func @transform_7(%arg0: i32) -> (i32, i32) {
    %c0_i32 = arith.constant 0 : i32
    %c0_i32_0 = arith.constant 0 : i32
    %c0_i32_1 = arith.constant 0 : i32
    return %c0_i32, %c0_i32_0 : i32, i32
  }
  func.func @transform_8(%arg0: i32) -> (i32, i32) {
    %c0_i32 = arith.constant 0 : i32
    %c0_i32_0 = arith.constant 0 : i32
    %c0_i32_1 = arith.constant 0 : i32
    return %c0_i32, %c0_i32_0 : i32, i32
  }
  func.func @transform_9(%arg0: i32) -> (i32, i32) {
    %c0_i32 = arith.constant 0 : i32
    %c0_i32_0 = arith.constant 0 : i32
    %c0_i32_1 = arith.constant 0 : i32
    return %c0_i32, %c0_i32_0 : i32, i32
  }
  func.func @transform_10(%arg0: i32) -> (i32, i32) {
    %c0_i32 = arith.constant 0 : i32
    %c0_i32_0 = arith.constant 0 : i32
    %c0_i32_1 = arith.constant 0 : i32
    return %c0_i32, %c0_i32_0 : i32, i32
  }
  func.func @transform_11(%arg0: i32) -> (i32, i32, i32) {
    %c0_i32 = arith.constant 0 : i32
    %c0_i32_0 = arith.constant 0 : i32
    %c0_i32_1 = arith.constant 0 : i32
    return %arg0, %c0_i32, %c0_i32_0 : i32, i32, i32
  }
}

</mosaic_0001>

<bundles_post_ra>
// kernel: tpu_custom_call.1
= control target key start
LH: loop header
LB: loop body
LE: loop exit
PB: predicated region body
PF: predicated region fallthrough
CT: control target
= control target key end

     0   :  { %16 = vsyncpa [#allocation3], 0  ;;  %s2210_s0 = inlined_call_operand.hbm [shape: f32[2,8,32], index: 0, kind: input, shape index: {}]   ;;  %s2211_s1 = inlined_call_operand.hbm [shape: f32[2,8,32], index: 1, kind: input, shape index: {}]   ;;  %s2212_s2 = inlined_call_operand.hbm [shape: f32[2,8,32], index: 2, kind: input, shape index: {}]   ;;  %s2213_s3 = inlined_call_operand.hbm [shape: bf16[32,32], index: 3, kind: input, shape index: {}]   ;;  %s2214_s4 = inlined_call_operand.hbm [shape: bf16[32,32], index: 4, kind: input, shape index: {}]   ;;  %s2215_s5 = inlined_call_operand.vmem [shape: bf16[32,32], index: 5, kind: input, shape index: {}]   ;;  %s2216_s6 = inlined_call_operand.hbm [shape: bf16[32,32], index: 6, kind: input, shape index: {}]   ;;  %s2217_s7 = inlined_call_operand.vmem [shape: f32[1,32], index: 7, kind: input, shape index: {}]   ;;  %s2218_s8 = inlined_call_operand.vmem [shape: f32[1,32], index: 8, kind: input, shape index: {}]   ;;  %s2219_s9 = inlined_call_operand.vmem [shape: f32[1,32], index: 9, kind: input, shape index: {}]   ;;  %s2220_s10 = inlined_call_operand.vmem [shape: f32[1,32], index: 10, kind: input, shape index: {}]   ;;  %s2221_s11 = inlined_call_operand.hbm [shape: f32[2,8,32], index: 11, kind: output, shape index: {}]  }
   0x1   :  { %17 = vsyncpa [#allocation6], 0 }
   0x2   :  { %18 = vsyncpa [#allocation9], 0 }
   0x3   :  { %19 = vsyncpa [#allocation12], 0 }
   0x4   :  { %20 = vsyncpa [#allocation4], 0  ;;  %s1796_s17 = smov [#allocation5]   ;;  %s1797_s19 = smov [#allocation8]  }
   0x5   :  { %s38_s18 = sshll.u32 %s1796_s17, 4  ;;  %s62_s20 = sshll.u32 %s1797_s19, 4  ;;  %s39_s18 = int_to_ptr.vmem [resolvable:$true] %s38_s18  ;;  %s1874_s20 = int_to_ptr.vmem [resolvable:$true] %s62_s20 }
   0x6   :  { %s1632_s23 = scalar_lea.hbm %s2211_s1, 256 }
   0x7   :  { %p1633_p0 = scmp.ne.s32.totalorder %s2211_s1, %s1632_s23  ;;  %p1636_p1 = scmp.lt.u32.totalorder %s1632_s23, %s2211_s1 }
   0x9   :  { %p1638_p2 = pnand %p1636_p1, %p1633_p0 }
   0xb   :  { %1641 = shalt.err (!%p1638_p2)
}
   0xc   :  { %s1642_s28 = scalar_lea.vmem %s39_s18, 256  ;;  %p1647_p4 = scmp.lt.s32.totalorder %s39_s18, %s39_s18 }
   0xd   :  { %p1643_p3 = scmp.ne.s32.totalorder %s39_s18, %s1642_s28  ;;  %p1648_p5 = scmp.lt.s32.totalorder %s1642_s28, %s1642_s28 }
   0xf   :  { %p1649_p6 = por %p1648_p5, %p1647_p4 }
  0x11   :  { %p1650_p7 = pnand %p1649_p6, %p1643_p3 }
  0x13   :  { %1653 = shalt.err (!%p1650_p7)
}
  0x14   :  { %s1798_s29 = smov 128   ;;  %s1799_s30 = smov 8  }
  0x15   :  { %44 = dma.hbm_to_vmem [thread:$0]  %s2211_s1, 256, %s39_s18, [#allocation6], %s1798_s29, %s1798_s29, %s1799_s30  }
  0x16   :  { %s1654_s16 = scalar_lea.hbm %s2213_s3, 256 }
  0x17   :  { %p1655_p8 = scmp.ne.s32.totalorder %s2213_s3, %s1654_s16  ;;  %p1658_p9 = scmp.lt.u32.totalorder %s1654_s16, %s2213_s3 }
  0x19   :  { %p1660_p10 = pnand %p1658_p9, %p1655_p8 }
  0x1b   :  { %1663 = shalt.err (!%p1660_p10)
}
  0x1c   :  { %s1664_s23 = scalar_lea.vmem %s1874_s20, 256  ;;  %p1669_p12 = scmp.lt.s32.totalorder %s1874_s20, %s1874_s20 }
  0x1d   :  { %p1665_p11 = scmp.ne.s32.totalorder %s1874_s20, %s1664_s23  ;;  %p1670_p13 = scmp.lt.s32.totalorder %s1664_s23, %s1664_s23 }
  0x1f   :  { %p1671_p0 = por %p1670_p13, %p1669_p12 }
  0x21   :  { %p1672_p1 = pnand %p1671_p0, %p1665_p11 }
  0x23   :  { %1675 = shalt.err (!%p1672_p1)
}
  0x24   :  { %s1800_s1 = smov 64   ;;  %s1801_s18 = smov 4  }
  0x25   :  { %68 = dma.hbm_to_vmem [thread:$0]  %s2213_s3, 256, %s1874_s20, [#allocation9], %s1800_s1, %s1800_s1, %s1801_s18  }
  0x26   :  { %s1802_s26 = smov [#allocation2]   ;;  %s1803_s28 = smov [#allocation7]  }
  0x27   :  { %s26_s27 = sshll.u32 %s1802_s26, 4  ;;  %s50_s12 = sshll.u32 %s1803_s28, 4  ;;  %s27_s27 = int_to_ptr.vmem [resolvable:$true] %s26_s27  ;;  %s1911_s12 = int_to_ptr.vmem [resolvable:$true] %s50_s12 }
  0x28   :  { %s1676_s15 = scalar_lea.hbm %s2210_s0, 256 }
  0x29   :  { %p1677_p2 = scmp.ne.s32.totalorder %s2210_s0, %s1676_s15  ;;  %p1680_p3 = scmp.lt.u32.totalorder %s1676_s15, %s2210_s0 }
  0x2b   :  { %p1682_p4 = pnand %p1680_p3, %p1677_p2 }
  0x2d   :  { %1685 = shalt.err (!%p1682_p4)
}
  0x2e   :  { %s1686_s3 = scalar_lea.vmem %s27_s27, 256  ;;  %p1691_p6 = scmp.lt.s32.totalorder %s27_s27, %s27_s27 }
  0x2f   :  { %p1687_p5 = scmp.ne.s32.totalorder %s27_s27, %s1686_s3  ;;  %p1692_p7 = scmp.lt.s32.totalorder %s1686_s3, %s1686_s3 }
  0x31   :  { %p1693_p8 = por %p1692_p7, %p1691_p6 }
  0x33   :  { %p1694_p9 = pnand %p1693_p8, %p1687_p5 }
  0x35   :  { %1697 = shalt.err (!%p1694_p9)
}
  0x36   :  { %32 = dma.hbm_to_vmem [thread:$0]  %s2210_s0, 256, %s27_s27, [#allocation3], %s1798_s29, %s1798_s29, %s1799_s30  }
  0x37   :  { %s1698_s25 = scalar_lea.hbm %s2212_s2, 256 }
  0x38   :  { %p1699_p10 = scmp.ne.s32.totalorder %s2212_s2, %s1698_s25  ;;  %p1702_p11 = scmp.lt.u32.totalorder %s1698_s25, %s2212_s2 }
  0x3a   :  { %p1704_p12 = pnand %p1702_p11, %p1699_p10 }
  0x3c   :  { %1707 = shalt.err (!%p1704_p12)
}
  0x3d   :  { %s1708_s15 = scalar_lea.vmem %s1911_s12, 256  ;;  %p1713_p0 = scmp.lt.s32.totalorder %s1911_s12, %s1911_s12 }
  0x3e   :  { %p1709_p13 = scmp.ne.s32.totalorder %s1911_s12, %s1708_s15  ;;  %p1714_p1 = scmp.lt.s32.totalorder %s1708_s15, %s1708_s15 }
  0x40   :  { %p1715_p2 = por %p1714_p1, %p1713_p0 }
  0x42   :  { %p1716_p3 = pnand %p1715_p2, %p1709_p13 }
  0x44   :  { %1719 = shalt.err (!%p1716_p3)
}
  0x45   :  { %56 = dma.hbm_to_vmem [thread:$0]  %s2212_s2, 256, %s1911_s12, [#allocation6], %s1798_s29, %s1798_s29, %s1799_s30  }
  0x46   :  { %s1804_s16 = smov [#allocation10]   ;;  %s1805_s19 = smov [#allocation11]  }
  0x47   :  { %s74_s17 = sshll.u32 %s1804_s16, 4  ;;  %s88_s21 = sshll.u32 %s1805_s19, 4  ;;  %s75_s17 = int_to_ptr.vmem [resolvable:$true] %s74_s17  ;;  %s1948_s21 = int_to_ptr.vmem [resolvable:$true] %s88_s21 }
  0x48   :  { %s1720_s22 = scalar_lea.hbm %s2214_s4, 256 }
  0x49   :  { %p1721_p4 = scmp.ne.s32.totalorder %s2214_s4, %s1720_s22  ;;  %p1724_p5 = scmp.lt.u32.totalorder %s1720_s22, %s2214_s4 }
  0x4b   :  { %p1726_p6 = pnand %p1724_p5, %p1721_p4 }
  0x4d   :  { %1729 = shalt.err (!%p1726_p6)
}
  0x4e   :  { %s1730_s2 = scalar_lea.vmem %s75_s17, 256  ;;  %p1735_p8 = scmp.lt.s32.totalorder %s75_s17, %s75_s17 }
  0x4f   :  { %p1731_p7 = scmp.ne.s32.totalorder %s75_s17, %s1730_s2  ;;  %p1736_p9 = scmp.lt.s32.totalorder %s1730_s2, %s1730_s2 }
  0x51   :  { %p1737_p10 = por %p1736_p9, %p1735_p8 }
  0x53   :  { %p1738_p11 = pnand %p1737_p10, %p1731_p7 }
  0x55   :  { %1741 = shalt.err (!%p1738_p11)
}
  0x56   :  { %80 = dma.hbm_to_vmem [thread:$0]  %s2214_s4, 256, %s75_s17, [#allocation9], %s1800_s1, %s1800_s1, %s1801_s18  }
  0x57   :  { %s1742_s15 = scalar_lea.hbm %s2216_s6, 256 }
  0x58   :  { %p1743_p12 = scmp.ne.s32.totalorder %s2216_s6, %s1742_s15  ;;  %p1746_p13 = scmp.lt.u32.totalorder %s1742_s15, %s2216_s6 }
  0x5a   :  { %p1748_p0 = pnand %p1746_p13, %p1743_p12 }
  0x5c   :  { %1751 = shalt.err (!%p1748_p0)
}
  0x5d   :  { %s1752_s3 = scalar_lea.vmem %s1948_s21, 256  ;;  %p1757_p2 = scmp.lt.s32.totalorder %s1948_s21, %s1948_s21 }
  0x5e   :  { %p1753_p1 = scmp.ne.s32.totalorder %s1948_s21, %s1752_s3  ;;  %p1758_p3 = scmp.lt.s32.totalorder %s1752_s3, %s1752_s3 }
  0x60   :  { %p1759_p4 = por %p1758_p3, %p1757_p2 }
  0x62   :  { %p1760_p5 = pnand %p1759_p4, %p1753_p1 }
  0x64   :  { %1763 = shalt.err (!%p1760_p5)
}
  0x65   :  { %94 = dma.hbm_to_vmem [thread:$0]  %s2216_s6, 256, %s1948_s21, [#allocation12], %s1800_s1, %s1800_s1, %s1801_s18  }
  0x66   :  { %1786 = dma.done.wait [#allocation3], 256  }
  0x67   :  { %1787 = vsyncadd [#allocation3], 4294967040 }
  0x68   :  { %1788 = dma.done.wait [#allocation6], 512  }
  0x69   :  { %1789 = vsyncadd [#allocation6], 4294966784 }
  0x6a   :  { %1790 = dma.done.wait [#allocation9], 512  }
  0x6b   :  { %1791 = vsyncadd [#allocation9], 4294966784 }
  0x6c   :  { %1792 = dma.done.wait [#allocation12], 256  }
  0x6d   :  { %1793 = vsyncadd [#allocation12], 4294967040  ;;  %v1806_v0 = vmov 0.0   ;;  %vm1807_vm0 = vmmov 0   ;;  %v1592_v1 = vld [vmem:[#allocation10] sm:$0xff]   ;;  %v1593_v2 = vld [vmem:[#allocation10 + $0x8] sm:$0xff]  }
  0x6e   :  { %1454 = vmatprep.subr.bf16.mxu1 %v1806_v0  ;;  %1446 = vmatprep.subr.bf16.mxu0 %v1806_v0  ;;  %v1594_v3 = vld [vmem:[#allocation8] sm:$0xff]   ;;  %v126_v5 = vld [vmem:[#allocation5 + $0x8] sm:$0xff]  ;;  %v122_v7 = vld [vmem:[#allocation2] sm:$0xff]  ;;  %vm154_vm1 = vcmask 261120   ;;  %vm351_vm2 = vcmask 64512   ;;  %vm471_vm3 = vcmask 1043456  }
  0x6f   :  { %1458 = vmatprep.mubr.msk.bf16.mxu1 %vm1807_vm0, %v1806_v0  ;;  %1450 = vmatprep.mubr.msk.bf16.mxu0 %vm1807_vm0, %v1806_v0  ;;  %v125_v4 = vld [vmem:[#allocation5] sm:$0xff]  ;;  %v1595_v6 = vld [vmem:[#allocation8 + $0x8] sm:$0xff]   ;;  %v123_v9 = vld [vmem:[#allocation2 + $0x8] sm:$0xff]  ;;  %s1810_s25 = smov 104   ;;  %s1811_s26 = smov 16   ;;  %vm1253_vm4 = vcmask 130048  }
  0x70   :  { %1455 = vmatpush3.bf16.msra.mxu1 %v1592_v1  ;;  %1447 = vmatpush3.bf16.msra.mxu0 %v1594_v3  ;;  %v127_v8 = vpack.c.bf16 %v126_v5, %v125_v4  ;;  %v124_v10 = vpack.c.bf16 %v123_v9, %v122_v7  ;;  %v1596_v11 = vld [vmem:[%s2215_s5] sm:$0xff]   ;;  %v1597_v12 = vld [vmem:[%s2215_s5 + $0x8] sm:$0xff]   ;;  %s1812_s2 = smov 24   ;;  %vm1258_vm5 = vcmask 195584   ;;  %s1813_s13 = smov [#allocation13]  }
  0x71   :  { %1456 = vmatprep.subr.bf16.mxu1 %v1806_v0  ;;  %1448 = vmatprep.subr.bf16.mxu0 %v1806_v0  ;;  %v128_v13 = vld [vmem:[#allocation7] sm:$0xff]  ;;  %v129_v14 = vld [vmem:[#allocation7 + $0x8] sm:$0xff]  ;;  %s1342_s14 = sshll.u32 %s1813_s13, 4  ;;  %s1343_s14 = int_to_ptr.vmem [resolvable:$true] %s1342_s14 }
  0x72   :  { %v130_v15 = vpack.c.bf16 %v129_v14, %v128_v13  ;;  %v1361_v16 = vld [vmem:[%s2218_s8] ss:$0 sm:$0xff]  ;;  %s1808_s8 = smov 120   ;;  %s1764_s15 = scalar_lea.vmem %s1343_s14, 256 }
  0x73   :  { %v1357_v21 = vld [vmem:[%s2217_s7] ss:$0 sm:$0xff]  ;;  %p1765_p6 = scmp.ne.s32.totalorder %s1343_s14, %s1764_s15  ;;  %p1769_p7 = scmp.lt.s32.totalorder %s1343_s14, %s1343_s14 }
  0x74   :  { %1457 = vmatpush3.bf16.msra.mxu1 %v1593_v2  ;;  %1449 = vmatpush3.bf16.msra.mxu0 %v1595_v6  ;;  %v1365_v36 = vld [vmem:[%s2219_s9] ss:$0 sm:$0xff]  ;;  %s1809_s9 = smov 112   ;;  %p1770_p8 = scmp.lt.s32.totalorder %s1764_s15, %s1764_s15 }
  0x75   :  { %1470 = vmatprep.subr.bf16.mxu1 %v1806_v0  ;;  %1462 = vmatprep.subr.bf16.mxu0 %v1806_v0 }
  0x76   :  { %p1771_p9 = por %p1770_p8, %p1769_p7 }
  0x77   :  { %1459 = vmatmul.mubr.msk.bf16.vlgmr.msra.gmra.mrb[0].mxu1 %vm154_vm1, %v127_v8  ;;  %1451 = vmatmul.mubr.msk.bf16.vlgmr.msra.gmra.mrb[0].mxu0 %vm154_vm1, %v124_v10 }
  0x78   :  { %1472 = vmatprep.mubr.msk.bf16.mxu1 %vm1807_vm0, %v1806_v0  ;;  %1463 = vmatpush3.bf16.msra.mxu0 %v1596_v11  ;;  %p1772_p10 = pnand %p1771_p9, %p1765_p6 }
  0x79   :  { %1466 = vmatprep.mubr.msk.bf16.mxu0 %vm1807_vm0, %v1806_v0  ;;  %1464 = vmatprep.subr.bf16.mxu0 %v1806_v0 }
  0x7c   :  { %1465 = vmatpush3.bf16.msra.mxu0 %v1597_v12 }
  0x7d   :  { %1476 = vmatprep.subr.bf16.mxu0 %v1806_v0 }
  0x7f   :  { %1467 = vmatmul.mubr.msk.bf16.vlgmr.msra.gmra.mrb[4].mxu0 %vm154_vm1, %v130_v15 }
  0x80   :  { %1478 = vmatprep.mubr.msk.bf16.mxu0 %vm1807_vm0, %v1806_v0 }
 0x14a   :  { %v259_v17 = vpop.f32.mrb[0].mxu1  ;;  %v192_v22 = vpop.f32.mrb[0].mxu0 }
 0x14b   :  { %v260_v18 = vadd.f32 %v1361_v16, %v259_v17  ;;  %v1460_v19 = vpop.f32.mrb[1].mxu1  ;;  %v1452_v26 = vpop.f32.mrb[1].mxu0  ;;  %v193_v29 = vadd.f32 %v1357_v21, %v192_v22 }
 0x14c   :  { %v262_v20 = vpop.f32.mrb[2].mxu1  ;;  %v195_v27 = vpop.f32.mrb[2].mxu0 }
 0x14d   :  { %v2018_v23 = vpack.c.bf16 %v260_v18, %v260_v18  ;;  %v263_v24 = vadd.f32 %v1361_v16, %v262_v20  ;;  %v1461_v25 = vpop.f32.mrb[3].mxu1  ;;  %v1453_v31 = vpop.f32.mrb[3].mxu0  ;;  %v2029_v33 = vpack.c.bf16 %v193_v29, %v193_v29  ;;  %v196_v34 = vadd.f32 %v1357_v21, %v195_v27 }
 0x14f   :  { %v2020_v28 = vpack.c.bf16 %v263_v24, %v263_v24  ;;  %v356_v30 = vsel %vm351_vm2, %v2018_v23, 0  ;;  %v2032_v35 = vpack.c.bf16 %v196_v34, %v196_v34 }
 0x150   :  { %1471 = vmatpush3.bf16.xpose.msra.mxu1 %v356_v30 }
 0x151   :  { %615 = vrot.lane.b32.xlu1 %v2020_v28, %s1808_s8  ;;  %v402_v32 = vsel %vm351_vm2, %v2020_v28, 0  ;;  %1482 = vmatprep.subr.bf16.mxu1 %v1806_v0 }
 0x152   :  { %1477 = vmatpush3.bf16.xpose.msra.mxu0 %v402_v32  ;;  %v326_v37 = vpop.f32.mrb[4].mxu0 }
 0x153   :  { %1488 = vmatprep.subr.bf16.mxu0 %v1806_v0  ;;  %v327_v38 = vadd.f32 %v1365_v36, %v326_v37  ;;  %v1468_v39 = vpop.f32.mrb[5].mxu0 }
 0x154   :  { %v329_v40 = vpop.f32.mrb[6].mxu0 }
 0x155   :  { %v330_v41 = vadd.f32 %v1365_v36, %v329_v40  ;;  %v1469_v42 = vpop.f32.mrb[7].mxu0  ;;  %v2045_v43 = vpack.c.bf16 %v327_v38, %v327_v38 }
 0x157   :  { %1473 = vmatmul.mubr.msk.bf16.vlgmr.msra.gmra.mrb[4].mxu1 %vm351_vm2, %v2029_v33  ;;  %v2047_v44 = vpack.c.bf16 %v330_v41, %v330_v41  ;;  %v473_v45 = vsel %vm471_vm3, %v2045_v43, 0 }
 0x158   :  { %1484 = vmatprep.mubr.msk.bf16.mxu1 %vm1807_vm0, %v1806_v0  ;;  %1483 = vmatpush3.bf16.msra.mxu1 %v473_v45 }
 0x159   :  { %1479 = vmatmul.mubr.msk.bf16.vlgmr.msra.gmra.mrb[8].mxu0 %vm351_vm2, %v2032_v35  ;;  %v519_v46 = vsel %vm471_vm3, %v2047_v44, 0  ;;  %1494 = vmatprep.subr.bf16.mxu1 %v1806_v0 }
 0x15a   :  { %1490 = vmatprep.mubr.msk.bf16.mxu0 %vm1807_vm0, %v1806_v0  ;;  %1489 = vmatpush3.bf16.msra.mxu0 %v519_v46 }
 0x15b   :  { %1500 = vmatprep.subr.bf16.mxu0 %v1806_v0 }
 0x1c3   :  { %v616_v4 = vpop.permute.xlu1 %615 }
 0x1c4   :  { %v621_v15 = vsel %vm351_vm2, %v616_v4, 0 }
 0x22a   :  { %v392_v47 = vpop.f32.mrb[4].mxu1 }
 0x22b   :  { %v1474_v48 = vpop.f32.mrb[5].mxu1  ;;  %v444_v49 = vsel %vm351_vm2, %v392_v47, -inf }
 0x22c   :  { %445 = vmax.xlane.f32.xlu0 %v444_v49  ;;  %v395_v50 = vpop.f32.mrb[6].mxu1  ;;  %v438_v51 = vpop.f32.mrb[8].mxu0 }
 0x22d   :  { %v1475_v52 = vpop.f32.mrb[7].mxu1  ;;  %v1480_v53 = vpop.f32.mrb[9].mxu0  ;;  %v447_v56 = vsel %vm351_vm2, %v438_v51, -inf }
 0x22e   :  { %v441_v54 = vpop.f32.mrb[10].mxu0 }
 0x22f   :  { %v1481_v55 = vpop.f32.mrb[11].mxu0 }
 0x230   :  { %448 = vmax.xlane.f32.xlu0 %v447_v56 }
 0x246   :  { %565 = vrot.lane.b32.xlu0 %v2018_v23, %s1808_s8 }
 0x2b9   :  { %v446_v57 = vpop.xlane.xlu0 %445 }
 0x2ba   :  { %v450_v58 = vsub.f32 %v392_v47, %v446_v57 }
 0x2bc   :  { %v452_v59 = vmul.f32 1.442695, %v450_v58 }
 0x2bd   :  { %v449_v60 = vpop.xlane.xlu0 %448 }
 0x2be   :  { %1600 = vpow2.f32 %v452_v59  ;;  %v451_v61 = vsub.f32 %v438_v51, %v449_v60 }
 0x2c0   :  { %v454_v62 = vmul.f32 1.442695, %v451_v61 }
 0x2c1   :  { %v566_v9 = vpop.permute.xlu0 %565 }
 0x2c2   :  { %1602 = vpow2.f32 %v454_v62  ;;  %v571_v12 = vsel %vm351_vm2, %v566_v9, 0 }
 0x2c8   :  { %v1601_v63 = vpop.eup %1600 }
 0x2c9   :  { %v456_v1 = vsel %vm351_vm2, %v1601_v63, 0.0 }
 0x2ca   :  { %457 = vadd.xlane.f32.xlu1 %v456_v1 }
 0x2cc   :  { %v1603_v2 = vpop.eup %1602 }
 0x2cd   :  { %v459_v3 = vsel %vm351_vm2, %v1603_v2, 0.0 }
 0x2ce   :  { %460 = vadd.xlane.f32.xlu1 %v459_v3 }
 0x2df   :  { %563 = vrot.lane.b32.xlu1 %v2029_v33, %s1808_s8 }
 0x2e3   :  { %613 = vrot.lane.b32.xlu1 %v2032_v35, %s1808_s8 }
 0x357   :  { %v458_v5 = vpop.xlane.xlu1 %457 }
 0x358   :  { %1604 = vrcp.f32 %v458_v5 }
 0x35b   :  { %v461_v6 = vpop.xlane.xlu1 %460 }
 0x35c   :  { %1606 = vrcp.f32 %v461_v6 }
 0x35f   :  { %v564_v16 = vpop.permute.xlu1 %563 }
 0x362   :  { %v1605_v7 = vpop.eup %1604 }
 0x363   :  { %v464_v8 = vmul.f32 %v1605_v7, %v1601_v63  ;;  %v614_v17 = vpop.permute.xlu1 %613 }
 0x365   :  { %v466_v10 = vpack.c.bf16 %v464_v8, %v464_v8 }
 0x366   :  { %v1607_v11 = vpop.eup %1606 }
 0x367   :  { %v465_v13 = vmul.f32 %v1607_v11, %v1603_v2  ;;  %1485 = vmatmul.mubr.msk.bf16.vlgmr.msra.gmra.mrb[8].mxu1 %vm351_vm2, %v466_v10 }
 0x368   :  { %1495 = vmatpush3.bf16.xpose.msra.mxu1 %v571_v12  ;;  %1496 = vmatprep.mubr.msk.bf16.mxu1 %vm1807_vm0, %v1806_v0 }
 0x369   :  { %v467_v14 = vpack.c.bf16 %v465_v13, %v465_v13  ;;  %1506 = vmatprep.subr.bf16.mxu1 %v1806_v0 }
 0x36b   :  { %1491 = vmatmul.mubr.msk.bf16.vlgmr.msra.gmra.mrb[12].mxu0 %vm351_vm2, %v467_v14 }
 0x36c   :  { %1501 = vmatpush3.bf16.xpose.msra.mxu0 %v621_v15  ;;  %1502 = vmatprep.mubr.msk.bf16.mxu0 %vm1807_vm0, %v1806_v0 }
 0x36d   :  { %1512 = vmatprep.subr.bf16.mxu0 %v1806_v0 }
 0x36f   :  { %1497 = vmatmul.mubr.msk.bf16.vlgmr.msra.gmra.mrb[12].mxu1 %vm351_vm2, %v564_v16 }
 0x370   :  { %1508 = vmatprep.mubr.msk.bf16.mxu1 %vm1807_vm0, %v1806_v0 }
 0x373   :  { %1503 = vmatmul.mubr.msk.bf16.vlgmr.msra.gmra.mrb[16].mxu0 %vm351_vm2, %v614_v17 }
 0x374   :  { %1514 = vmatprep.mubr.msk.bf16.mxu0 %vm1807_vm0, %v1806_v0 }
 0x43a   :  { %v2081_v18 = vpop.f32.mrb[8].mxu1 }
 0x43b   :  { %v1486_v19 = vpop.f32.mrb[9].mxu1 }
 0x43c   :  { %v512_v20 = vpop.f32.mrb[10].mxu1 }
 0x43d   :  { %v1487_v21 = vpop.f32.mrb[11].mxu1 }
 0x43e   :  { %v2083_v22 = vpop.f32.mrb[12].mxu0 }
 0x43f   :  { %v1492_v24 = vpop.f32.mrb[13].mxu0 }
 0x440   :  { %v558_v25 = vpop.f32.mrb[14].mxu0 }
 0x441   :  { %v1493_v26 = vpop.f32.mrb[15].mxu0 }
 0x442   :  { %v607_v27 = vpop.f32.mrb[12].mxu1 }
 0x443   :  { %v1498_v29 = vpop.f32.mrb[13].mxu1  ;;  %v663_v30 = vsel %vm351_vm2, %v607_v27, -inf }
 0x444   :  { %664 = vmax.xlane.f32.xlu0 %v663_v30  ;;  %v610_v31 = vpop.f32.mrb[14].mxu1 }
 0x445   :  { %v1499_v32 = vpop.f32.mrb[15].mxu1 }
 0x446   :  { %v657_v34 = vpop.f32.mrb[16].mxu0 }
 0x447   :  { %v1504_v36 = vpop.f32.mrb[17].mxu0  ;;  %v666_v37 = vsel %vm351_vm2, %v657_v34, -inf }
 0x448   :  { %667 = vmax.xlane.f32.xlu1 %v666_v37  ;;  %v660_v38 = vpop.f32.mrb[18].mxu0 }
 0x449   :  { %v1505_v39 = vpop.f32.mrb[19].mxu0 }
 0x459   :  { %735 = vrot.lane.b32.xlu1 %v2047_v44, %s1808_s8 }
 0x45d   :  { %787 = vrot.lane.b32.xlu1 %v2018_v23, %s1809_s9 }
 0x461   :  { %837 = vrot.lane.b32.xlu1 %v2020_v28, %s1809_s9 }
 0x465   :  { %835 = vrot.lane.b32.xlu1 %v2032_v35, %s1809_s9 }
 0x4d1   :  { %v665_v40 = vpop.xlane.xlu0 %664 }
 0x4d2   :  { %v669_v41 = vsub.f32 %v607_v27, %v665_v40 }
 0x4d4   :  { %v671_v42 = vmul.f32 1.442695, %v669_v41 }
 0x4d5   :  { %v668_v45 = vpop.xlane.xlu1 %667 }
 0x4d6   :  { %1608 = vpow2.f32 %v671_v42  ;;  %v670_v46 = vsub.f32 %v657_v34, %v668_v45 }
 0x4d8   :  { %v673_v47 = vmul.f32 1.442695, %v670_v46 }
 0x4d9   :  { %v736_v48 = vpop.permute.xlu1 %735 }
 0x4da   :  { %1610 = vpow2.f32 %v673_v47  ;;  %v741_v49 = vsel %vm471_vm3, %v736_v48, 0 }
 0x4db   :  { %1513 = vmatpush3.bf16.msra.mxu0 %v741_v49 }
 0x4dc   :  { %1524 = vmatprep.subr.bf16.mxu0 %v1806_v0 }
 0x4dd   :  { %v788_v59 = vpop.permute.xlu1 %787 }
 0x4de   :  { %v793_v2 = vsel %vm351_vm2, %v788_v59, 0 }
 0x4e0   :  { %v1609_v50 = vpop.eup %1608 }
 0x4e1   :  { %v675_v51 = vsel %vm351_vm2, %v1609_v50, 0.0  ;;  %v838_v1 = vpop.permute.xlu1 %837 }
 0x4e2   :  { %676 = vadd.xlane.f32.xlu0 %v675_v51  ;;  %v843_v4 = vsel %vm351_vm2, %v838_v1, 0 }
 0x4e4   :  { %v1611_v52 = vpop.eup %1610 }
 0x4e5   :  { %v678_v53 = vsel %vm351_vm2, %v1611_v52, 0.0  ;;  %v836_v6 = vpop.permute.xlu1 %835 }
 0x4e6   :  { %679 = vadd.xlane.f32.xlu0 %v678_v53 }
 0x4fc   :  { %687 = vrot.lane.b32.xlu0 %v2045_v43, %s1808_s8 }
 0x500   :  { %785 = vrot.lane.b32.xlu0 %v2029_v33, %s1809_s9 }
 0x56f   :  { %v677_v54 = vpop.xlane.xlu0 %676 }
 0x570   :  { %1612 = vrcp.f32 %v677_v54 }
 0x573   :  { %v680_v55 = vpop.xlane.xlu0 %679 }
 0x574   :  { %1614 = vrcp.f32 %v680_v55 }
 0x577   :  { %v688_v56 = vpop.permute.xlu0 %687 }
 0x578   :  { %v693_v57 = vsel %vm471_vm3, %v688_v56, 0 }
 0x579   :  { %1507 = vmatpush3.bf16.msra.mxu1 %v693_v57 }
 0x57a   :  { %v1613_v58 = vpop.eup %1612  ;;  %1518 = vmatprep.subr.bf16.mxu1 %v1806_v0 }
 0x57b   :  { %v683_v60 = vmul.f32 %v1613_v58, %v1609_v50  ;;  %v786_v5 = vpop.permute.xlu0 %785 }
 0x57d   :  { %v685_v61 = vpack.c.bf16 %v683_v60, %v683_v60 }
 0x57e   :  { %v1615_v62 = vpop.eup %1614 }
 0x57f   :  { %v684_v63 = vmul.f32 %v1615_v62, %v1611_v52  ;;  %1509 = vmatmul.mubr.msk.bf16.vlgmr.msra.gmra.mrb[16].mxu1 %vm351_vm2, %v685_v61 }
 0x580   :  { %1520 = vmatprep.mubr.msk.bf16.mxu1 %vm1807_vm0, %v1806_v0 }
 0x581   :  { %v686_v3 = vpack.c.bf16 %v684_v63, %v684_v63 }
 0x582   :  { %1519 = vmatpush3.bf16.xpose.msra.mxu1 %v793_v2 }
 0x583   :  { %1515 = vmatmul.mubr.msk.bf16.vlgmr.msra.gmra.mrb[20].mxu0 %vm351_vm2, %v686_v3  ;;  %1530 = vmatprep.subr.bf16.mxu1 %v1806_v0 }
 0x584   :  { %1525 = vmatpush3.bf16.xpose.msra.mxu0 %v843_v4  ;;  %1526 = vmatprep.mubr.msk.bf16.mxu0 %vm1807_vm0, %v1806_v0 }
 0x585   :  { %1536 = vmatprep.subr.bf16.mxu0 %v1806_v0 }
 0x589   :  { %1521 = vmatmul.mubr.msk.bf16.vlgmr.msra.gmra.mrb[20].mxu1 %vm351_vm2, %v786_v5 }
 0x58a   :  { %1532 = vmatprep.mubr.msk.bf16.mxu1 %vm1807_vm0, %v1806_v0 }
 0x58b   :  { %1527 = vmatmul.mubr.msk.bf16.vlgmr.msra.gmra.mrb[24].mxu0 %vm351_vm2, %v836_v6 }
 0x58c   :  { %1538 = vmatprep.mubr.msk.bf16.mxu0 %vm1807_vm0, %v1806_v0 }
 0x652   :  { %v2121_v7 = vpop.f32.mrb[16].mxu1 }
 0x653   :  { %v1510_v8 = vpop.f32.mrb[17].mxu1 }
 0x654   :  { %v732_v9 = vpop.f32.mrb[18].mxu1 }
 0x655   :  { %v1511_v10 = vpop.f32.mrb[19].mxu1 }
 0x656   :  { %v2123_v11 = vpop.f32.mrb[20].mxu0 }
 0x657   :  { %v1516_v12 = vpop.f32.mrb[21].mxu0 }
 0x658   :  { %v780_v13 = vpop.f32.mrb[22].mxu0 }
 0x659   :  { %v1517_v14 = vpop.f32.mrb[23].mxu0 }
 0x65a   :  { %v783_v14 = vpack.c.bf16 %v2121_v7, %v2121_v7 }
 0x65c   :  { %v829_v15 = vpop.f32.mrb[20].mxu1 }
 0x65d   :  { %v1522_v16 = vpop.f32.mrb[21].mxu1  ;;  %v885_v17 = vsel %vm351_vm2, %v829_v15, -inf }
 0x65e   :  { %886 = vmax.xlane.f32.xlu0 %v885_v17  ;;  %v832_v19 = vpop.f32.mrb[22].mxu1  ;;  %v879_v20 = vpop.f32.mrb[24].mxu0 }
 0x65f   :  { %v1523_v21 = vpop.f32.mrb[23].mxu1  ;;  %v1528_v24 = vpop.f32.mrb[25].mxu0  ;;  %v888_v25 = vsel %vm351_vm2, %v879_v20, -inf }
 0x660   :  { %889 = vmax.xlane.f32.xlu1 %v888_v25  ;;  %v882_v26 = vpop.f32.mrb[26].mxu0 }
 0x661   :  { %v1529_v27 = vpop.f32.mrb[27].mxu0 }
 0x671   :  { %957 = vrot.lane.b32.xlu1 %v2047_v44, %s1809_s9 }
 0x675   :  { %1009 = vrot.lane.b32.xlu1 %v2018_v23, %s1810_s25 }
 0x679   :  { %1059 = vrot.lane.b32.xlu1 %v2020_v28, %s1810_s25 }
 0x67d   :  { %1057 = vrot.lane.b32.xlu1 %v2032_v35, %s1810_s25 }
 0x6eb   :  { %v887_v29 = vpop.xlane.xlu0 %886 }
 0x6ec   :  { %v891_v30 = vsub.f32 %v829_v15, %v887_v29  ;;  %v784_v15 = vpack.c.bf16 %v2123_v11, %v2123_v11 }
 0x6ed   :  { %v890_v31 = vpop.xlane.xlu1 %889 }
 0x6ee   :  { %v893_v32 = vmul.f32 1.442695, %v891_v30  ;;  %v892_v34 = vsub.f32 %v879_v20, %v890_v31 }
 0x6f0   :  { %1616 = vpow2.f32 %v893_v32  ;;  %v895_v36 = vmul.f32 1.442695, %v892_v34 }
 0x6f1   :  { %v958_v37 = vpop.permute.xlu1 %957 }
 0x6f2   :  { %1618 = vpow2.f32 %v895_v36  ;;  %v963_v38 = vsel %vm471_vm3, %v958_v37, 0 }
 0x6f3   :  { %1537 = vmatpush3.bf16.msra.mxu0 %v963_v38 }
 0x6f4   :  { %1548 = vmatprep.subr.bf16.mxu0 %v1806_v0 }
 0x6f5   :  { %v1010_v47 = vpop.permute.xlu1 %1009 }
 0x6f9   :  { %v1060_v52 = vpop.permute.xlu1 %1059 }
 0x6fa   :  { %v1617_v23 = vpop.eup %1616  ;;  %v1065_v54 = vsel %vm351_vm2, %v1060_v52, 0 }
 0x6fb   :  { %v897_v28 = vsel %vm351_vm2, %v1617_v23, 0.0 }
 0x6fc   :  { %v1619_v39 = vpop.eup %1618  ;;  %898 = vadd.xlane.f32.xlu0 %v897_v28 }
 0x6fd   :  { %v900_v35 = vsel %vm351_vm2, %v1619_v39, 0.0  ;;  %v1058_v56 = vpop.permute.xlu1 %1057 }
 0x700   :  { %901 = vadd.xlane.f32.xlu0 %v900_v35  ;;  %v1598_v35 = vld [vmem:[#allocation11] sm:$0xff]  }
 0x716   :  { %909 = vrot.lane.b32.xlu0 %v2045_v43, %s1809_s9 }
 0x71a   :  { %1007 = vrot.lane.b32.xlu0 %v2029_v33, %s1810_s25  ;;  %v1015_v33 = vsel %vm351_vm2, %v1010_v47, 0 }
 0x789   :  { %v899_v40 = vpop.xlane.xlu0 %898 }
 0x78a   :  { %1620 = vrcp.f32 %v899_v40  ;;  %v1599_v40 = vld [vmem:[#allocation11 + $0x8] sm:$0xff]  }
 0x78d   :  { %v902_v41 = vpop.xlane.xlu0 %901 }
 0x78e   :  { %1622 = vrcp.f32 %v902_v41 }
 0x791   :  { %v910_v42 = vpop.permute.xlu0 %909 }
 0x792   :  { %v915_v45 = vsel %vm471_vm3, %v910_v42, 0 }
 0x793   :  { %1531 = vmatpush3.bf16.msra.mxu1 %v915_v45 }
 0x794   :  { %v1621_v46 = vpop.eup %1620  ;;  %1542 = vmatprep.subr.bf16.mxu1 %v1806_v0 }
 0x795   :  { %v905_v48 = vmul.f32 %v1621_v46, %v1617_v23  ;;  %v1008_v55 = vpop.permute.xlu0 %1007 }
 0x797   :  { %v907_v49 = vpack.c.bf16 %v905_v48, %v905_v48 }
 0x798   :  { %v1623_v50 = vpop.eup %1622 }
 0x799   :  { %v906_v51 = vmul.f32 %v1623_v50, %v1619_v39  ;;  %1533 = vmatmul.mubr.msk.bf16.vlgmr.msra.gmra.mrb[24].mxu1 %vm351_vm2, %v907_v49 }
 0x79a   :  { %1544 = vmatprep.mubr.msk.bf16.mxu1 %vm1807_vm0, %v1806_v0 }
 0x79b   :  { %v908_v53 = vpack.c.bf16 %v906_v51, %v906_v51 }
 0x79c   :  { %1543 = vmatpush3.bf16.xpose.msra.mxu1 %v1015_v33 }
 0x79d   :  { %1539 = vmatmul.mubr.msk.bf16.vlgmr.msra.gmra.mrb[28].mxu0 %vm351_vm2, %v908_v53  ;;  %1554 = vmatprep.subr.bf16.mxu1 %v1806_v0 }
 0x79e   :  { %1549 = vmatpush3.bf16.xpose.msra.mxu0 %v1065_v54  ;;  %1550 = vmatprep.mubr.msk.bf16.mxu0 %vm1807_vm0, %v1806_v0 }
 0x79f   :  { %1560 = vmatprep.subr.bf16.mxu0 %v1806_v0 }
 0x7a3   :  { %1545 = vmatmul.mubr.msk.bf16.vlgmr.msra.gmra.mrb[28].mxu1 %vm351_vm2, %v1008_v55 }
 0x7a4   :  { %1556 = vmatprep.mubr.msk.bf16.mxu1 %vm1807_vm0, %v1806_v0 }
 0x7a5   :  { %1551 = vmatmul.mubr.msk.bf16.vlgmr.msra.gmra.mrb[32].mxu0 %vm351_vm2, %v1058_v56  ;;  %v562_v56 = vpack.c.bf16 %v2083_v22, %v2083_v22 }
 0x7a6   :  { %1562 = vmatprep.mubr.msk.bf16.mxu0 %vm1807_vm0, %v1806_v0 }
 0x86c   :  { %v951_v57 = vpop.f32.mrb[24].mxu1 }
 0x86d   :  { %v1534_v58 = vpop.f32.mrb[25].mxu1  ;;  %v1005_v30 = vpack.c.bf16 %v951_v57, %v951_v57 }
 0x86e   :  { %v954_v59 = vpop.f32.mrb[26].mxu1 }
 0x86f   :  { %v1535_v60 = vpop.f32.mrb[27].mxu1 }
 0x870   :  { %v999_v61 = vpop.f32.mrb[28].mxu0 }
 0x871   :  { %v1540_v62 = vpop.f32.mrb[29].mxu0  ;;  %v1006_v16 = vpack.c.bf16 %v999_v61, %v999_v61 }
 0x872   :  { %v1002_v63 = vpop.f32.mrb[30].mxu0 }
 0x873   :  { %v1541_v1 = vpop.f32.mrb[31].mxu0 }
 0x876   :  { %v1051_v2 = vpop.f32.mrb[28].mxu1 }
 0x877   :  { %v1546_v3 = vpop.f32.mrb[29].mxu1  ;;  %v1107_v4 = vsel %vm351_vm2, %v1051_v2, -inf }
 0x878   :  { %1108 = vmax.xlane.f32.xlu0 %v1107_v4  ;;  %v1054_v5 = vpop.f32.mrb[30].mxu1  ;;  %v1101_v6 = vpop.f32.mrb[32].mxu0 }
 0x879   :  { %v1547_v8 = vpop.f32.mrb[31].mxu1  ;;  %v1552_v9 = vpop.f32.mrb[33].mxu0  ;;  %v1110_v10 = vsel %vm351_vm2, %v1101_v6, -inf }
 0x87a   :  { %1111 = vmax.xlane.f32.xlu1 %v1110_v10  ;;  %v1104_v12 = vpop.f32.mrb[34].mxu0 }
 0x87b   :  { %v1553_v13 = vpop.f32.mrb[35].mxu0 }
 0x88b   :  { %1179 = vrot.lane.b32.xlu1 %v2047_v44, %s1810_s25 }
 0x88f   :  { %1231 = vrot.lane.b32.xlu1 %v783_v14, %s1799_s30 }
 0x893   :  { %1233 = vrot.lane.b32.xlu1 %v784_v15, %s1799_s30 }
 0x897   :  { %1239 = vrot.lane.b32.xlu1 %v1006_v16, %s1811_s26 }
 0x905   :  { %v1109_v17 = vpop.xlane.xlu0 %1108 }
 0x906   :  { %v1113_v19 = vsub.f32 %v1051_v2, %v1109_v17 }
 0x907   :  { %v1112_v20 = vpop.xlane.xlu1 %1111 }
 0x908   :  { %v1115_v21 = vmul.f32 1.442695, %v1113_v19  ;;  %v1114_v24 = vsub.f32 %v1101_v6, %v1112_v20 }
 0x90a   :  { %1624 = vpow2.f32 %v1115_v21  ;;  %v1117_v44 = vmul.f32 1.442695, %v1114_v24 }
 0x90b   :  { %v1180_v25 = vpop.permute.xlu1 %1179 }
 0x90c   :  { %1626 = vpow2.f32 %v1117_v44  ;;  %v1185_v7 = vsel %vm471_vm3, %v1180_v25, 0 }
 0x90d   :  { %1561 = vmatpush3.bf16.msra.mxu0 %v1185_v7 }
 0x90f   :  { %v1232_v33 = vpop.permute.xlu1 %1231 }
 0x913   :  { %v1234_v53 = vpop.permute.xlu1 %1233 }
 0x914   :  { %v1625_v26 = vpop.eup %1624  ;;  %v1252_v59 = vsel %vm351_vm2, %v562_v56, %v1234_v53 }
 0x915   :  { %v1119_v11 = vsel %vm351_vm2, %v1625_v26, 0.0 }
 0x916   :  { %v1627_v27 = vpop.eup %1626  ;;  %1120 = vadd.xlane.f32.xlu0 %v1119_v11 }
 0x917   :  { %v1122_v29 = vsel %vm351_vm2, %v1627_v27, 0.0  ;;  %v1240_v55 = vpop.permute.xlu1 %1239 }
 0x918   :  { %v1257_v60 = vsel %vm1253_vm4, %v1252_v59, %v1240_v55 }
 0x91a   :  { %1123 = vadd.xlane.f32.xlu0 %v1122_v29 }
 0x930   :  { %1131 = vrot.lane.b32.xlu0 %v2045_v43, %s1810_s25 }
 0x934   :  { %1237 = vrot.lane.b32.xlu0 %v1005_v30, %s1811_s26 }
 0x9a3   :  { %v1121_v31 = vpop.xlane.xlu0 %1120 }
 0x9a4   :  { %1628 = vrcp.f32 %v1121_v31 }
 0x9a7   :  { %v1124_v32 = vpop.xlane.xlu0 %1123 }
 0x9a8   :  { %1630 = vrcp.f32 %v1124_v32 }
 0x9ab   :  { %v1132_v34 = vpop.permute.xlu0 %1131 }
 0x9ac   :  { %v1137_v36 = vsel %vm471_vm3, %v1132_v34, 0 }
 0x9ad   :  { %1555 = vmatpush3.bf16.msra.mxu1 %v1137_v36 }
 0x9ae   :  { %v1629_v37 = vpop.eup %1628  ;;  %1566 = vmatprep.subr.bf16.mxu1 %v1806_v0 }
 0x9af   :  { %v1127_v38 = vmul.f32 %v1629_v37, %v1625_v26  ;;  %v1238_v54 = vpop.permute.xlu0 %1237 }
 0x9b1   :  { %v1129_v23 = vpack.c.bf16 %v1127_v38, %v1127_v38 }
 0x9b2   :  { %v1631_v28 = vpop.eup %1630 }
 0x9b3   :  { %v1128_v39 = vmul.f32 %v1631_v28, %v1627_v27  ;;  %1557 = vmatmul.mubr.msk.bf16.vlgmr.msra.gmra.mrb[32].mxu1 %vm351_vm2, %v1129_v23 }
 0x9b4   :  { %1570 = vmatprep.mubr.msk.bf16.mxu1 %vm1807_vm0, %v1806_v0  ;;  %1567 = vmatpush3.bf16.msra.mxu1 %v1598_v35 }
 0x9b5   :  { %v1130_v43 = vpack.c.bf16 %v1128_v39, %v1128_v39  ;;  %1568 = vmatprep.subr.bf16.mxu1 %v1806_v0  ;;  %v561_v0 = vpack.c.bf16 %v2081_v18, %v2081_v18  ;;  %v1391_v18 = vld [vmem:[%s2220_s10] ss:$0 sm:$0xff] }
 0x9b7   :  { %1563 = vmatmul.mubr.msk.bf16.vlgmr.msra.gmra.mrb[36].mxu0 %vm351_vm2, %v1130_v43  ;;  %v1249_v58 = vsel %vm351_vm2, %v561_v0, %v1232_v33 }
 0x9b8   :  { %1569 = vmatpush3.bf16.msra.mxu1 %v1599_v40  ;;  %v1255_v61 = vsel %vm1253_vm4, %v1249_v58, %v1238_v54 }
 0xa86   :  { %v1173_v41 = vpop.f32.mrb[32].mxu1 }
 0xa87   :  { %v1227_v42 = vpack.c.bf16 %v1173_v41, %v1173_v41  ;;  %v1558_v45 = vpop.f32.mrb[33].mxu1 }
 0xa88   :  { %v1176_v46 = vpop.f32.mrb[34].mxu1 }
 0xa89   :  { %1243 = vrot.lane.b32.xlu0 %v1227_v42, %s1812_s2  ;;  %v1559_v47 = vpop.f32.mrb[35].mxu1 }
 0xa8a   :  { %v1221_v48 = vpop.f32.mrb[36].mxu0 }
 0xa8b   :  { %v1228_v49 = vpack.c.bf16 %v1221_v48, %v1221_v48  ;;  %v1564_v50 = vpop.f32.mrb[37].mxu0 }
 0xa8c   :  { %v1224_v51 = vpop.f32.mrb[38].mxu0 }
 0xa8d   :  { %1245 = vrot.lane.b32.xlu1 %v1228_v49, %s1812_s2  ;;  %v1565_v52 = vpop.f32.mrb[39].mxu0 }
 0xafb   :  { %v1244_v57 = vpop.permute.xlu0 %1243 }
 0xafc   :  { %v1260_v63 = vsel %vm1258_vm5, %v1255_v61, %v1244_v57 }
 0xaff   :  { %v1246_v62 = vpop.permute.xlu1 %1245 }
 0xb00   :  { %v1262_v1 = vsel %vm1258_vm5, %v1257_v60, %v1246_v62 }
 0xb01   :  { %v1392_v2 = vcombine.low %v1260_v63, %v1262_v1 }
 0xb03   :  { %1571 = vmatmul.mubr.msk.bf16.vlgmr.msra.gmra.mrb[36].mxu1 %vm154_vm1, %v1392_v2 }
 0xbd6   :  { %v1328_v22 = vpop.f32.mrb[36].mxu1 }
 0xbd7   :  { %v1329_v3 = vadd.f32 %v1391_v18, %v1328_v22  ;;  %v1572_v4 = vpop.f32.mrb[37].mxu1 }
 0xbd8   :  { %v1331_v5 = vpop.f32.mrb[38].mxu1 }
 0xbd9   :  { %1335 = vst.msk [vmem:[#allocation13] sm:$0xff] %vm154_vm1, %v1329_v3  ;;  %v1332_v6 = vadd.f32 %v1391_v18, %v1331_v5  ;;  %v1573_v8 = vpop.f32.mrb[39].mxu1 }
 0xbdb   :  { %1336 = vst.msk [vmem:[#allocation13 + $0x8] sm:$0xff] %vm154_vm1, %v1332_v6 }
 0xbdc   :  { %1775 = shalt.err (!%p1772_p10)
}
 0xbdd   :  { %s1776_s27 = scalar_lea.hbm %s2221_s11, 256 }
 0xbde   :  { %p1777_p11 = scmp.ne.s32.totalorder %s2221_s11, %s1776_s27  ;;  %p1780_p12 = scmp.lt.u32.totalorder %s1776_s27, %s2221_s11 }
 0xbe0   :  { %p1782_p13 = pnand %p1780_p12, %p1777_p11 }
 0xbe2   :  { %1785 = shalt.err (!%p1782_p13)
}
 0xbe3   :  { %1348 = dma.vmem_to_hbm [thread:$0]  %s1343_s14, 256, %s2221_s11, [#allocation4], %s1798_s29, %s1798_s29, %s1799_s30  }
 0xbe4   :  { %1794 = dma.done.wait [#allocation4], 256  }
 0xbe5   :  { %1795 = vsyncadd [#allocation4], 4294967040 }
 0xbe6   :  { %1352 = vsyncpa [#allocation3], 1 }
 0xbe7   :  { %1353 = vsyncpa [#allocation6], 1 }
 0xbe8   :  { %1354 = vsyncpa [#allocation9], 1 }
 0xbe9   :  { %1355 = vsyncpa [#allocation12], 1 }
 0xbea   :  { %1356 = vsyncpa [#allocation4], 1 }

// kernel: tpu_custom_call.1
= control target key start
LH: loop header
LB: loop body
LE: loop exit
PB: predicated region body
PF: predicated region fallthrough
CT: control target
= control target key end

     0   :  { %16 = vsyncpa [#allocation3], 0  ;;  %s2210_s0 = inlined_call_operand.hbm [shape: f32[2,8,32], index: 0, kind: input, shape index: {}]   ;;  %s2211_s1 = inlined_call_operand.hbm [shape: f32[2,8,32], index: 1, kind: input, shape index: {}]   ;;  %s2212_s2 = inlined_call_operand.hbm [shape: f32[2,8,32], index: 2, kind: input, shape index: {}]   ;;  %s2213_s3 = inlined_call_operand.hbm [shape: bf16[32,32], index: 3, kind: input, shape index: {}]   ;;  %s2214_s4 = inlined_call_operand.hbm [shape: bf16[32,32], index: 4, kind: input, shape index: {}]   ;;  %s2215_s5 = inlined_call_operand.vmem [shape: bf16[32,32], index: 5, kind: input, shape index: {}]   ;;  %s2216_s6 = inlined_call_operand.hbm [shape: bf16[32,32], index: 6, kind: input, shape index: {}]   ;;  %s2217_s7 = inlined_call_operand.vmem [shape: f32[1,32], index: 7, kind: input, shape index: {}]   ;;  %s2218_s8 = inlined_call_operand.vmem [shape: f32[1,32], index: 8, kind: input, shape index: {}]   ;;  %s2219_s9 = inlined_call_operand.vmem [shape: f32[1,32], index: 9, kind: input, shape index: {}]   ;;  %s2220_s10 = inlined_call_operand.vmem [shape: f32[1,32], index: 10, kind: input, shape index: {}]   ;;  %s2221_s11 = inlined_call_operand.hbm [shape: f32[2,8,32], index: 11, kind: output, shape index: {}]  }
   0x1   :  { %17 = vsyncpa [#allocation6], 0 }
   0x2   :  { %18 = vsyncpa [#allocation9], 0 }
   0x3   :  { %19 = vsyncpa [#allocation12], 0 }
   0x4   :  { %20 = vsyncpa [#allocation4], 0  ;;  %s1796_s17 = smov [#allocation5]   ;;  %s1797_s19 = smov [#allocation8]  }
   0x5   :  { %s38_s18 = sshll.u32 %s1796_s17, 4  ;;  %s62_s20 = sshll.u32 %s1797_s19, 4  ;;  %s39_s18 = int_to_ptr.vmem [resolvable:$true] %s38_s18  ;;  %s1874_s20 = int_to_ptr.vmem [resolvable:$true] %s62_s20 }
   0x6   :  { %s1632_s23 = scalar_lea.hbm %s2211_s1, 256 }
   0x7   :  { %p1633_p0 = scmp.ne.s32.totalorder %s2211_s1, %s1632_s23  ;;  %p1636_p1 = scmp.lt.u32.totalorder %s1632_s23, %s2211_s1 }
   0x9   :  { %p1638_p2 = pnand %p1636_p1, %p1633_p0 }
   0xb   :  { %1641 = shalt.err (!%p1638_p2)
}
   0xc   :  { %s1642_s28 = scalar_lea.vmem %s39_s18, 256  ;;  %p1647_p4 = scmp.lt.s32.totalorder %s39_s18, %s39_s18 }
   0xd   :  { %p1643_p3 = scmp.ne.s32.totalorder %s39_s18, %s1642_s28  ;;  %p1648_p5 = scmp.lt.s32.totalorder %s1642_s28, %s1642_s28 }
   0xf   :  { %p1649_p6 = por %p1648_p5, %p1647_p4 }
  0x11   :  { %p1650_p7 = pnand %p1649_p6, %p1643_p3 }
  0x13   :  { %1653 = shalt.err (!%p1650_p7)
}
  0x14   :  { %s1798_s29 = smov 128   ;;  %s1799_s30 = smov 8  }
  0x15   :  { %44 = dma.hbm_to_vmem [thread:$0]  %s2211_s1, 256, %s39_s18, [#allocation6], %s1798_s29, %s1798_s29, %s1799_s30  }
  0x16   :  { %s1654_s16 = scalar_lea.hbm %s2213_s3, 256 }
  0x17   :  { %p1655_p8 = scmp.ne.s32.totalorder %s2213_s3, %s1654_s16  ;;  %p1658_p9 = scmp.lt.u32.totalorder %s1654_s16, %s2213_s3 }
  0x19   :  { %p1660_p10 = pnand %p1658_p9, %p1655_p8 }
  0x1b   :  { %1663 = shalt.err (!%p1660_p10)
}
  0x1c   :  { %s1664_s23 = scalar_lea.vmem %s1874_s20, 256  ;;  %p1669_p12 = scmp.lt.s32.totalorder %s1874_s20, %s1874_s20 }
  0x1d   :  { %p1665_p11 = scmp.ne.s32.totalorder %s1874_s20, %s1664_s23  ;;  %p1670_p13 = scmp.lt.s32.totalorder %s1664_s23, %s1664_s23 }
  0x1f   :  { %p1671_p0 = por %p1670_p13, %p1669_p12 }
  0x21   :  { %p1672_p1 = pnand %p1671_p0, %p1665_p11 }
  0x23   :  { %1675 = shalt.err (!%p1672_p1)
}
  0x24   :  { %s1800_s1 = smov 64   ;;  %s1801_s18 = smov 4  }
  0x25   :  { %68 = dma.hbm_to_vmem [thread:$0]  %s2213_s3, 256, %s1874_s20, [#allocation9], %s1800_s1, %s1800_s1, %s1801_s18  }
  0x26   :  { %s1802_s26 = smov [#allocation2]   ;;  %s1803_s28 = smov [#allocation7]  }
  0x27   :  { %s26_s27 = sshll.u32 %s1802_s26, 4  ;;  %s50_s12 = sshll.u32 %s1803_s28, 4  ;;  %s27_s27 = int_to_ptr.vmem [resolvable:$true] %s26_s27  ;;  %s1911_s12 = int_to_ptr.vmem [resolvable:$true] %s50_s12 }
  0x28   :  { %s1676_s15 = scalar_lea.hbm %s2210_s0, 256 }
  0x29   :  { %p1677_p2 = scmp.ne.s32.totalorder %s2210_s0, %s1676_s15  ;;  %p1680_p3 = scmp.lt.u32.totalorder %s1676_s15, %s2210_s0 }
  0x2b   :  { %p1682_p4 = pnand %p1680_p3, %p1677_p2 }
  0x2d   :  { %1685 = shalt.err (!%p1682_p4)
}
  0x2e   :  { %s1686_s3 = scalar_lea.vmem %s27_s27, 256  ;;  %p1691_p6 = scmp.lt.s32.totalorder %s27_s27, %s27_s27 }
  0x2f   :  { %p1687_p5 = scmp.ne.s32.totalorder %s27_s27, %s1686_s3  ;;  %p1692_p7 = scmp.lt.s32.totalorder %s1686_s3, %s1686_s3 }
  0x31   :  { %p1693_p8 = por %p1692_p7, %p1691_p6 }
  0x33   :  { %p1694_p9 = pnand %p1693_p8, %p1687_p5 }
  0x35   :  { %1697 = shalt.err (!%p1694_p9)
}
  0x36   :  { %32 = dma.hbm_to_vmem [thread:$0]  %s2210_s0, 256, %s27_s27, [#allocation3], %s1798_s29, %s1798_s29, %s1799_s30  }
  0x37   :  { %s1698_s25 = scalar_lea.hbm %s2212_s2, 256 }
  0x38   :  { %p1699_p10 = scmp.ne.s32.totalorder %s2212_s2, %s1698_s25  ;;  %p1702_p11 = scmp.lt.u32.totalorder %s1698_s25, %s2212_s2 }
  0x3a   :  { %p1704_p12 = pnand %p1702_p11, %p1699_p10 }
  0x3c   :  { %1707 = shalt.err (!%p1704_p12)
}
  0x3d   :  { %s1708_s15 = scalar_lea.vmem %s1911_s12, 256  ;;  %p1713_p0 = scmp.lt.s32.totalorder %s1911_s12, %s1911_s12 }
  0x3e   :  { %p1709_p13 = scmp.ne.s32.totalorder %s1911_s12, %s1708_s15  ;;  %p1714_p1 = scmp.lt.s32.totalorder %s1708_s15, %s1708_s15 }
  0x40   :  { %p1715_p2 = por %p1714_p1, %p1713_p0 }
  0x42   :  { %p1716_p3 = pnand %p1715_p2, %p1709_p13 }
  0x44   :  { %1719 = shalt.err (!%p1716_p3)
}
  0x45   :  { %56 = dma.hbm_to_vmem [thread:$0]  %s2212_s2, 256, %s1911_s12, [#allocation6], %s1798_s29, %s1798_s29, %s1799_s30  }
  0x46   :  { %s1804_s16 = smov [#allocation10]   ;;  %s1805_s19 = smov [#allocation11]  }
  0x47   :  { %s74_s17 = sshll.u32 %s1804_s16, 4  ;;  %s88_s21 = sshll.u32 %s1805_s19, 4  ;;  %s75_s17 = int_to_ptr.vmem [resolvable:$true] %s74_s17  ;;  %s1948_s21 = int_to_ptr.vmem [resolvable:$true] %s88_s21 }
  0x48   :  { %s1720_s22 = scalar_lea.hbm %s2214_s4, 256 }
  0x49   :  { %p1721_p4 = scmp.ne.s32.totalorder %s2214_s4, %s1720_s22  ;;  %p1724_p5 = scmp.lt.u32.totalorder %s1720_s22, %s2214_s4 }
  0x4b   :  { %p1726_p6 = pnand %p1724_p5, %p1721_p4 }
  0x4d   :  { %1729 = shalt.err (!%p1726_p6)
}
  0x4e   :  { %s1730_s2 = scalar_lea.vmem %s75_s17, 256  ;;  %p1735_p8 = scmp.lt.s32.totalorder %s75_s17, %s75_s17 }
  0x4f   :  { %p1731_p7 = scmp.ne.s32.totalorder %s75_s17, %s1730_s2  ;;  %p1736_p9 = scmp.lt.s32.totalorder %s1730_s2, %s1730_s2 }
  0x51   :  { %p1737_p10 = por %p1736_p9, %p1735_p8 }
  0x53   :  { %p1738_p11 = pnand %p1737_p10, %p1731_p7 }
  0x55   :  { %1741 = shalt.err (!%p1738_p11)
}
  0x56   :  { %80 = dma.hbm_to_vmem [thread:$0]  %s2214_s4, 256, %s75_s17, [#allocation9], %s1800_s1, %s1800_s1, %s1801_s18  }
  0x57   :  { %s1742_s15 = scalar_lea.hbm %s2216_s6, 256 }
  0x58   :  { %p1743_p12 = scmp.ne.s32.totalorder %s2216_s6, %s1742_s15  ;;  %p1746_p13 = scmp.lt.u32.totalorder %s1742_s15, %s2216_s6 }
  0x5a   :  { %p1748_p0 = pnand %p1746_p13, %p1743_p12 }
  0x5c   :  { %1751 = shalt.err (!%p1748_p0)
}
  0x5d   :  { %s1752_s3 = scalar_lea.vmem %s1948_s21, 256  ;;  %p1757_p2 = scmp.lt.s32.totalorder %s1948_s21, %s1948_s21 }
  0x5e   :  { %p1753_p1 = scmp.ne.s32.totalorder %s1948_s21, %s1752_s3  ;;  %p1758_p3 = scmp.lt.s32.totalorder %s1752_s3, %s1752_s3 }
  0x60   :  { %p1759_p4 = por %p1758_p3, %p1757_p2 }
  0x62   :  { %p1760_p5 = pnand %p1759_p4, %p1753_p1 }
  0x64   :  { %1763 = shalt.err (!%p1760_p5)
}
  0x65   :  { %94 = dma.hbm_to_vmem [thread:$0]  %s2216_s6, 256, %s1948_s21, [#allocation12], %s1800_s1, %s1800_s1, %s1801_s18  }
  0x66   :  { %1786 = dma.done.wait [#allocation3], 256  }
  0x67   :  { %1787 = vsyncadd [#allocation3], 4294967040 }
  0x68   :  { %1788 = dma.done.wait [#allocation6], 512  }
  0x69   :  { %1789 = vsyncadd [#allocation6], 4294966784 }
  0x6a   :  { %1790 = dma.done.wait [#allocation9], 512  }
  0x6b   :  { %1791 = vsyncadd [#allocation9], 4294966784 }
  0x6c   :  { %1792 = dma.done.wait [#allocation12], 256  }
  0x6d   :  { %1793 = vsyncadd [#allocation12], 4294967040  ;;  %v1806_v0 = vmov 0.0   ;;  %vm1807_vm0 = vmmov 0   ;;  %v1592_v1 = vld [vmem:[#allocation10] sm:$0xff]   ;;  %v1593_v2 = vld [vmem:[#allocation10 + $0x8] sm:$0xff]  }
  0x6e   :  { %1454 = vmatprep.subr.bf16.mxu1 %v1806_v0  ;;  %1446 = vmatprep.subr.bf16.mxu0 %v1806_v0  ;;  %v1594_v3 = vld [vmem:[#allocation8] sm:$0xff]   ;;  %v126_v5 = vld [vmem:[#allocation5 + $0x8] sm:$0xff]  ;;  %v122_v7 = vld [vmem:[#allocation2] sm:$0xff]  ;;  %vm154_vm1 = vcmask 261120   ;;  %vm351_vm2 = vcmask 64512   ;;  %vm471_vm3 = vcmask 1043456  }
  0x6f   :  { %1458 = vmatprep.mubr.msk.bf16.mxu1 %vm1807_vm0, %v1806_v0  ;;  %1450 = vmatprep.mubr.msk.bf16.mxu0 %vm1807_vm0, %v1806_v0  ;;  %v125_v4 = vld [vmem:[#allocation5] sm:$0xff]  ;;  %v1595_v6 = vld [vmem:[#allocation8 + $0x8] sm:$0xff]   ;;  %v123_v9 = vld [vmem:[#allocation2 + $0x8] sm:$0xff]  ;;  %s1810_s25 = smov 104   ;;  %s1811_s26 = smov 16   ;;  %vm1253_vm4 = vcmask 130048  }
  0x70   :  { %1455 = vmatpush3.bf16.msra.mxu1 %v1592_v1  ;;  %1447 = vmatpush3.bf16.msra.mxu0 %v1594_v3  ;;  %v127_v8 = vpack.c.bf16 %v126_v5, %v125_v4  ;;  %v124_v10 = vpack.c.bf16 %v123_v9, %v122_v7  ;;  %v1596_v11 = vld [vmem:[%s2215_s5] sm:$0xff]   ;;  %v1597_v12 = vld [vmem:[%s2215_s5 + $0x8] sm:$0xff]   ;;  %s1812_s2 = smov 24   ;;  %vm1258_vm5 = vcmask 195584   ;;  %s1813_s13 = smov [#allocation13]  }
  0x71   :  { %1456 = vmatprep.subr.bf16.mxu1 %v1806_v0  ;;  %1448 = vmatprep.subr.bf16.mxu0 %v1806_v0  ;;  %v128_v13 = vld [vmem:[#allocation7] sm:$0xff]  ;;  %v129_v14 = vld [vmem:[#allocation7 + $0x8] sm:$0xff]  ;;  %s1342_s14 = sshll.u32 %s1813_s13, 4  ;;  %s1343_s14 = int_to_ptr.vmem [resolvable:$true] %s1342_s14 }
  0x72   :  { %v130_v15 = vpack.c.bf16 %v129_v14, %v128_v13  ;;  %v1361_v16 = vld [vmem:[%s2218_s8] ss:$0 sm:$0xff]  ;;  %s1808_s8 = smov 120   ;;  %s1764_s15 = scalar_lea.vmem %s1343_s14, 256 }
  0x73   :  { %v1357_v21 = vld [vmem:[%s2217_s7] ss:$0 sm:$0xff]  ;;  %p1765_p6 = scmp.ne.s32.totalorder %s1343_s14, %s1764_s15  ;;  %p1769_p7 = scmp.lt.s32.totalorder %s1343_s14, %s1343_s14 }
  0x74   :  { %1457 = vmatpush3.bf16.msra.mxu1 %v1593_v2  ;;  %1449 = vmatpush3.bf16.msra.mxu0 %v1595_v6  ;;  %v1365_v36 = vld [vmem:[%s2219_s9] ss:$0 sm:$0xff]  ;;  %s1809_s9 = smov 112   ;;  %p1770_p8 = scmp.lt.s32.totalorder %s1764_s15, %s1764_s15 }
  0x75   :  { %1470 = vmatprep.subr.bf16.mxu1 %v1806_v0  ;;  %1462 = vmatprep.subr.bf16.mxu0 %v1806_v0 }
  0x76   :  { %p1771_p9 = por %p1770_p8, %p1769_p7 }
  0x77   :  { %1459 = vmatmul.mubr.msk.bf16.vlgmr.msra.gmra.mrb[0].mxu1 %vm154_vm1, %v127_v8  ;;  %1451 = vmatmul.mubr.msk.bf16.vlgmr.msra.gmra.mrb[0].mxu0 %vm154_vm1, %v124_v10 }
  0x78   :  { %1472 = vmatprep.mubr.msk.bf16.mxu1 %vm1807_vm0, %v1806_v0  ;;  %1463 = vmatpush3.bf16.msra.mxu0 %v1596_v11  ;;  %p1772_p10 = pnand %p1771_p9, %p1765_p6 }
  0x79   :  { %1466 = vmatprep.mubr.msk.bf16.mxu0 %vm1807_vm0, %v1806_v0  ;;  %1464 = vmatprep.subr.bf16.mxu0 %v1806_v0 }
  0x7c   :  { %1465 = vmatpush3.bf16.msra.mxu0 %v1597_v12 }
  0x7d   :  { %1476 = vmatprep.subr.bf16.mxu0 %v1806_v0 }
  0x7f   :  { %1467 = vmatmul.mubr.msk.bf16.vlgmr.msra.gmra.mrb[4].mxu0 %vm154_vm1, %v130_v15 }
  0x80   :  { %1478 = vmatprep.mubr.msk.bf16.mxu0 %vm1807_vm0, %v1806_v0 }
 0x14a   :  { %v259_v17 = vpop.f32.mrb[0].mxu1  ;;  %v192_v22 = vpop.f32.mrb[0].mxu0 }
 0x14b   :  { %v260_v18 = vadd.f32 %v1361_v16, %v259_v17  ;;  %v1460_v19 = vpop.f32.mrb[1].mxu1  ;;  %v1452_v26 = vpop.f32.mrb[1].mxu0  ;;  %v193_v29 = vadd.f32 %v1357_v21, %v192_v22 }
 0x14c   :  { %v262_v20 = vpop.f32.mrb[2].mxu1  ;;  %v195_v27 = vpop.f32.mrb[2].mxu0 }
 0x14d   :  { %v2018_v23 = vpack.c.bf16 %v260_v18, %v260_v18  ;;  %v263_v24 = vadd.f32 %v1361_v16, %v262_v20  ;;  %v1461_v25 = vpop.f32.mrb[3].mxu1  ;;  %v1453_v31 = vpop.f32.mrb[3].mxu0  ;;  %v2029_v33 = vpack.c.bf16 %v193_v29, %v193_v29  ;;  %v196_v34 = vadd.f32 %v1357_v21, %v195_v27 }
 0x14f   :  { %v2020_v28 = vpack.c.bf16 %v263_v24, %v263_v24  ;;  %v356_v30 = vsel %vm351_vm2, %v2018_v23, 0  ;;  %v2032_v35 = vpack.c.bf16 %v196_v34, %v196_v34 }
 0x150   :  { %1471 = vmatpush3.bf16.xpose.msra.mxu1 %v356_v30 }
 0x151   :  { %615 = vrot.lane.b32.xlu1 %v2020_v28, %s1808_s8  ;;  %v402_v32 = vsel %vm351_vm2, %v2020_v28, 0  ;;  %1482 = vmatprep.subr.bf16.mxu1 %v1806_v0 }
 0x152   :  { %1477 = vmatpush3.bf16.xpose.msra.mxu0 %v402_v32  ;;  %v326_v37 = vpop.f32.mrb[4].mxu0 }
 0x153   :  { %1488 = vmatprep.subr.bf16.mxu0 %v1806_v0  ;;  %v327_v38 = vadd.f32 %v1365_v36, %v326_v37  ;;  %v1468_v39 = vpop.f32.mrb[5].mxu0 }
 0x154   :  { %v329_v40 = vpop.f32.mrb[6].mxu0 }
 0x155   :  { %v330_v41 = vadd.f32 %v1365_v36, %v329_v40  ;;  %v1469_v42 = vpop.f32.mrb[7].mxu0  ;;  %v2045_v43 = vpack.c.bf16 %v327_v38, %v327_v38 }
 0x157   :  { %1473 = vmatmul.mubr.msk.bf16.vlgmr.msra.gmra.mrb[4].mxu1 %vm351_vm2, %v2029_v33  ;;  %v2047_v44 = vpack.c.bf16 %v330_v41, %v330_v41  ;;  %v473_v45 = vsel %vm471_vm3, %v2045_v43, 0 }
 0x158   :  { %1484 = vmatprep.mubr.msk.bf16.mxu1 %vm1807_vm0, %v1806_v0  ;;  %1483 = vmatpush3.bf16.msra.mxu1 %v473_v45 }
 0x159   :  { %1479 = vmatmul.mubr.msk.bf16.vlgmr.msra.gmra.mrb[8].mxu0 %vm351_vm2, %v2032_v35  ;;  %v519_v46 = vsel %vm471_vm3, %v2047_v44, 0  ;;  %1494 = vmatprep.subr.bf16.mxu1 %v1806_v0 }
 0x15a   :  { %1490 = vmatprep.mubr.msk.bf16.mxu0 %vm1807_vm0, %v1806_v0  ;;  %1489 = vmatpush3.bf16.msra.mxu0 %v519_v46 }
 0x15b   :  { %1500 = vmatprep.subr.bf16.mxu0 %v1806_v0 }
 0x1c3   :  { %v616_v4 = vpop.permute.xlu1 %615 }
 0x1c4   :  { %v621_v15 = vsel %vm351_vm2, %v616_v4, 0 }
 0x22a   :  { %v392_v47 = vpop.f32.mrb[4].mxu1 }
 0x22b   :  { %v1474_v48 = vpop.f32.mrb[5].mxu1  ;;  %v444_v49 = vsel %vm351_vm2, %v392_v47, -inf }
 0x22c   :  { %445 = vmax.xlane.f32.xlu0 %v444_v49  ;;  %v395_v50 = vpop.f32.mrb[6].mxu1  ;;  %v438_v51 = vpop.f32.mrb[8].mxu0 }
 0x22d   :  { %v1475_v52 = vpop.f32.mrb[7].mxu1  ;;  %v1480_v53 = vpop.f32.mrb[9].mxu0  ;;  %v447_v56 = vsel %vm351_vm2, %v438_v51, -inf }
 0x22e   :  { %v441_v54 = vpop.f32.mrb[10].mxu0 }
 0x22f   :  { %v1481_v55 = vpop.f32.mrb[11].mxu0 }
 0x230   :  { %448 = vmax.xlane.f32.xlu0 %v447_v56 }
 0x246   :  { %565 = vrot.lane.b32.xlu0 %v2018_v23, %s1808_s8 }
 0x2b9   :  { %v446_v57 = vpop.xlane.xlu0 %445 }
 0x2ba   :  { %v450_v58 = vsub.f32 %v392_v47, %v446_v57 }
 0x2bc   :  { %v452_v59 = vmul.f32 1.442695, %v450_v58 }
 0x2bd   :  { %v449_v60 = vpop.xlane.xlu0 %448 }
 0x2be   :  { %1600 = vpow2.f32 %v452_v59  ;;  %v451_v61 = vsub.f32 %v438_v51, %v449_v60 }
 0x2c0   :  { %v454_v62 = vmul.f32 1.442695, %v451_v61 }
 0x2c1   :  { %v566_v9 = vpop.permute.xlu0 %565 }
 0x2c2   :  { %1602 = vpow2.f32 %v454_v62  ;;  %v571_v12 = vsel %vm351_vm2, %v566_v9, 0 }
 0x2c8   :  { %v1601_v63 = vpop.eup %1600 }
 0x2c9   :  { %v456_v1 = vsel %vm351_vm2, %v1601_v63, 0.0 }
 0x2ca   :  { %457 = vadd.xlane.f32.xlu1 %v456_v1 }
 0x2cc   :  { %v1603_v2 = vpop.eup %1602 }
 0x2cd   :  { %v459_v3 = vsel %vm351_vm2, %v1603_v2, 0.0 }
 0x2ce   :  { %460 = vadd.xlane.f32.xlu1 %v459_v3 }
 0x2df   :  { %563 = vrot.lane.b32.xlu1 %v2029_v33, %s1808_s8 }
 0x2e3   :  { %613 = vrot.lane.b32.xlu1 %v2032_v35, %s1808_s8 }
 0x357   :  { %v458_v5 = vpop.xlane.xlu1 %457 }
 0x358   :  { %1604 = vrcp.f32 %v458_v5 }
 0x35b   :  { %v461_v6 = vpop.xlane.xlu1 %460 }
 0x35c   :  { %1606 = vrcp.f32 %v461_v6 }
 0x35f   :  { %v564_v16 = vpop.permute.xlu1 %563 }
 0x362   :  { %v1605_v7 = vpop.eup %1604 }
 0x363   :  { %v464_v8 = vmul.f32 %v1605_v7, %v1601_v63  ;;  %v614_v17 = vpop.permute.xlu1 %613 }
 0x365   :  { %v466_v10 = vpack.c.bf16 %v464_v8, %v464_v8 }
 0x366   :  { %v1607_v11 = vpop.eup %1606 }
 0x367   :  { %v465_v13 = vmul.f32 %v1607_v11, %v1603_v2  ;;  %1485 = vmatmul.mubr.msk.bf16.vlgmr.msra.gmra.mrb[8].mxu1 %vm351_vm2, %v466_v10 }
 0x368   :  { %1495 = vmatpush3.bf16.xpose.msra.mxu1 %v571_v12  ;;  %1496 = vmatprep.mubr.msk.bf16.mxu1 %vm1807_vm0, %v1806_v0 }
 0x369   :  { %v467_v14 = vpack.c.bf16 %v465_v13, %v465_v13  ;;  %1506 = vmatprep.subr.bf16.mxu1 %v1806_v0 }
 0x36b   :  { %1491 = vmatmul.mubr.msk.bf16.vlgmr.msra.gmra.mrb[12].mxu0 %vm351_vm2, %v467_v14 }
 0x36c   :  { %1501 = vmatpush3.bf16.xpose.msra.mxu0 %v621_v15  ;;  %1502 = vmatprep.mubr.msk.bf16.mxu0 %vm1807_vm0, %v1806_v0 }
 0x36d   :  { %1512 = vmatprep.subr.bf16.mxu0 %v1806_v0 }
 0x36f   :  { %1497 = vmatmul.mubr.msk.bf16.vlgmr.msra.gmra.mrb[12].mxu1 %vm351_vm2, %v564_v16 }
 0x370   :  { %1508 = vmatprep.mubr.msk.bf16.mxu1 %vm1807_vm0, %v1806_v0 }
 0x373   :  { %1503 = vmatmul.mubr.msk.bf16.vlgmr.msra.gmra.mrb[16].mxu0 %vm351_vm2, %v614_v17 }
 0x374   :  { %1514 = vmatprep.mubr.msk.bf16.mxu0 %vm1807_vm0, %v1806_v0 }
 0x43a   :  { %v2081_v18 = vpop.f32.mrb[8].mxu1 }
 0x43b   :  { %v1486_v19 = vpop.f32.mrb[9].mxu1 }
 0x43c   :  { %v512_v20 = vpop.f32.mrb[10].mxu1 }
 0x43d   :  { %v1487_v21 = vpop.f32.mrb[11].mxu1 }
 0x43e   :  { %v2083_v22 = vpop.f32.mrb[12].mxu0 }
 0x43f   :  { %v1492_v24 = vpop.f32.mrb[13].mxu0 }
 0x440   :  { %v558_v25 = vpop.f32.mrb[14].mxu0 }
 0x441   :  { %v1493_v26 = vpop.f32.mrb[15].mxu0 }
 0x442   :  { %v607_v27 = vpop.f32.mrb[12].mxu1 }
 0x443   :  { %v1498_v29 = vpop.f32.mrb[13].mxu1  ;;  %v663_v30 = vsel %vm351_vm2, %v607_v27, -inf }
 0x444   :  { %664 = vmax.xlane.f32.xlu0 %v663_v30  ;;  %v610_v31 = vpop.f32.mrb[14].mxu1 }
 0x445   :  { %v1499_v32 = vpop.f32.mrb[15].mxu1 }
 0x446   :  { %v657_v34 = vpop.f32.mrb[16].mxu0 }
 0x447   :  { %v1504_v36 = vpop.f32.mrb[17].mxu0  ;;  %v666_v37 = vsel %vm351_vm2, %v657_v34, -inf }
 0x448   :  { %667 = vmax.xlane.f32.xlu1 %v666_v37  ;;  %v660_v38 = vpop.f32.mrb[18].mxu0 }
 0x449   :  { %v1505_v39 = vpop.f32.mrb[19].mxu0 }
 0x459   :  { %735 = vrot.lane.b32.xlu1 %v2047_v44, %s1808_s8 }
 0x45d   :  { %787 = vrot.lane.b32.xlu1 %v2018_v23, %s1809_s9 }
 0x461   :  { %837 = vrot.lane.b32.xlu1 %v2020_v28, %s1809_s9 }
 0x465   :  { %835 = vrot.lane.b32.xlu1 %v2032_v35, %s1809_s9 }
 0x4d1   :  { %v665_v40 = vpop.xlane.xlu0 %664 }
 0x4d2   :  { %v669_v41 = vsub.f32 %v607_v27, %v665_v40 }
 0x4d4   :  { %v671_v42 = vmul.f32 1.442695, %v669_v41 }
 0x4d5   :  { %v668_v45 = vpop.xlane.xlu1 %667 }
 0x4d6   :  { %1608 = vpow2.f32 %v671_v42  ;;  %v670_v46 = vsub.f32 %v657_v34, %v668_v45 }
 0x4d8   :  { %v673_v47 = vmul.f32 1.442695, %v670_v46 }
 0x4d9   :  { %v736_v48 = vpop.permute.xlu1 %735 }
 0x4da   :  { %1610 = vpow2.f32 %v673_v47  ;;  %v741_v49 = vsel %vm471_vm3, %v736_v48, 0 }
 0x4db   :  { %1513 = vmatpush3.bf16.msra.mxu0 %v741_v49 }
 0x4dc   :  { %1524 = vmatprep.subr.bf16.mxu0 %v1806_v0 }
 0x4dd   :  { %v788_v59 = vpop.permute.xlu1 %787 }
 0x4de   :  { %v793_v2 = vsel %vm351_vm2, %v788_v59, 0 }
 0x4e0   :  { %v1609_v50 = vpop.eup %1608 }
 0x4e1   :  { %v675_v51 = vsel %vm351_vm2, %v1609_v50, 0.0  ;;  %v838_v1 = vpop.permute.xlu1 %837 }
 0x4e2   :  { %676 = vadd.xlane.f32.xlu0 %v675_v51  ;;  %v843_v4 = vsel %vm351_vm2, %v838_v1, 0 }
 0x4e4   :  { %v1611_v52 = vpop.eup %1610 }
 0x4e5   :  { %v678_v53 = vsel %vm351_vm2, %v1611_v52, 0.0  ;;  %v836_v6 = vpop.permute.xlu1 %835 }
 0x4e6   :  { %679 = vadd.xlane.f32.xlu0 %v678_v53 }
 0x4fc   :  { %687 = vrot.lane.b32.xlu0 %v2045_v43, %s1808_s8 }
 0x500   :  { %785 = vrot.lane.b32.xlu0 %v2029_v33, %s1809_s9 }
 0x56f   :  { %v677_v54 = vpop.xlane.xlu0 %676 }
 0x570   :  { %1612 = vrcp.f32 %v677_v54 }
 0x573   :  { %v680_v55 = vpop.xlane.xlu0 %679 }
 0x574   :  { %1614 = vrcp.f32 %v680_v55 }
 0x577   :  { %v688_v56 = vpop.permute.xlu0 %687 }
 0x578   :  { %v693_v57 = vsel %vm471_vm3, %v688_v56, 0 }
 0x579   :  { %1507 = vmatpush3.bf16.msra.mxu1 %v693_v57 }
 0x57a   :  { %v1613_v58 = vpop.eup %1612  ;;  %1518 = vmatprep.subr.bf16.mxu1 %v1806_v0 }
 0x57b   :  { %v683_v60 = vmul.f32 %v1613_v58, %v1609_v50  ;;  %v786_v5 = vpop.permute.xlu0 %785 }
 0x57d   :  { %v685_v61 = vpack.c.bf16 %v683_v60, %v683_v60 }
 0x57e   :  { %v1615_v62 = vpop.eup %1614 }
 0x57f   :  { %v684_v63 = vmul.f32 %v1615_v62, %v1611_v52  ;;  %1509 = vmatmul.mubr.msk.bf16.vlgmr.msra.gmra.mrb[16].mxu1 %vm351_vm2, %v685_v61 }
 0x580   :  { %1520 = vmatprep.mubr.msk.bf16.mxu1 %vm1807_vm0, %v1806_v0 }
 0x581   :  { %v686_v3 = vpack.c.bf16 %v684_v63, %v684_v63 }
 0x582   :  { %1519 = vmatpush3.bf16.xpose.msra.mxu1 %v793_v2 }
 0x583   :  { %1515 = vmatmul.mubr.msk.bf16.vlgmr.msra.gmra.mrb[20].mxu0 %vm351_vm2, %v686_v3  ;;  %1530 = vmatprep.subr.bf16.mxu1 %v1806_v0 }
 0x584   :  { %1525 = vmatpush3.bf16.xpose.msra.mxu0 %v843_v4  ;;  %1526 = vmatprep.mubr.msk.bf16.mxu0 %vm1807_vm0, %v1806_v0 }
 0x585   :  { %1536 = vmatprep.subr.bf16.mxu0 %v1806_v0 }
 0x589   :  { %1521 = vmatmul.mubr.msk.bf16.vlgmr.msra.gmra.mrb[20].mxu1 %vm351_vm2, %v786_v5 }
 0x58a   :  { %1532 = vmatprep.mubr.msk.bf16.mxu1 %vm1807_vm0, %v1806_v0 }
 0x58b   :  { %1527 = vmatmul.mubr.msk.bf16.vlgmr.msra.gmra.mrb[24].mxu0 %vm351_vm2, %v836_v6 }
 0x58c   :  { %1538 = vmatprep.mubr.msk.bf16.mxu0 %vm1807_vm0, %v1806_v0 }
 0x652   :  { %v2121_v7 = vpop.f32.mrb[16].mxu1 }
 0x653   :  { %v1510_v8 = vpop.f32.mrb[17].mxu1 }
 0x654   :  { %v732_v9 = vpop.f32.mrb[18].mxu1 }
 0x655   :  { %v1511_v10 = vpop.f32.mrb[19].mxu1 }
 0x656   :  { %v2123_v11 = vpop.f32.mrb[20].mxu0 }
 0x657   :  { %v1516_v12 = vpop.f32.mrb[21].mxu0 }
 0x658   :  { %v780_v13 = vpop.f32.mrb[22].mxu0 }
 0x659   :  { %v1517_v14 = vpop.f32.mrb[23].mxu0 }
 0x65a   :  { %v783_v14 = vpack.c.bf16 %v2121_v7, %v2121_v7 }
 0x65c   :  { %v829_v15 = vpop.f32.mrb[20].mxu1 }
 0x65d   :  { %v1522_v16 = vpop.f32.mrb[21].mxu1  ;;  %v885_v17 = vsel %vm351_vm2, %v829_v15, -inf }
 0x65e   :  { %886 = vmax.xlane.f32.xlu0 %v885_v17  ;;  %v832_v19 = vpop.f32.mrb[22].mxu1  ;;  %v879_v20 = vpop.f32.mrb[24].mxu0 }
 0x65f   :  { %v1523_v21 = vpop.f32.mrb[23].mxu1  ;;  %v1528_v24 = vpop.f32.mrb[25].mxu0  ;;  %v888_v25 = vsel %vm351_vm2, %v879_v20, -inf }
 0x660   :  { %889 = vmax.xlane.f32.xlu1 %v888_v25  ;;  %v882_v26 = vpop.f32.mrb[26].mxu0 }
 0x661   :  { %v1529_v27 = vpop.f32.mrb[27].mxu0 }
 0x671   :  { %957 = vrot.lane.b32.xlu1 %v2047_v44, %s1809_s9 }
 0x675   :  { %1009 = vrot.lane.b32.xlu1 %v2018_v23, %s1810_s25 }
 0x679   :  { %1059 = vrot.lane.b32.xlu1 %v2020_v28, %s1810_s25 }
 0x67d   :  { %1057 = vrot.lane.b32.xlu1 %v2032_v35, %s1810_s25 }
 0x6eb   :  { %v887_v29 = vpop.xlane.xlu0 %886 }
 0x6ec   :  { %v891_v30 = vsub.f32 %v829_v15, %v887_v29  ;;  %v784_v15 = vpack.c.bf16 %v2123_v11, %v2123_v11 }
 0x6ed   :  { %v890_v31 = vpop.xlane.xlu1 %889 }
 0x6ee   :  { %v893_v32 = vmul.f32 1.442695, %v891_v30  ;;  %v892_v34 = vsub.f32 %v879_v20, %v890_v31 }
 0x6f0   :  { %1616 = vpow2.f32 %v893_v32  ;;  %v895_v36 = vmul.f32 1.442695, %v892_v34 }
 0x6f1   :  { %v958_v37 = vpop.permute.xlu1 %957 }
 0x6f2   :  { %1618 = vpow2.f32 %v895_v36  ;;  %v963_v38 = vsel %vm471_vm3, %v958_v37, 0 }
 0x6f3   :  { %1537 = vmatpush3.bf16.msra.mxu0 %v963_v38 }
 0x6f4   :  { %1548 = vmatprep.subr.bf16.mxu0 %v1806_v0 }
 0x6f5   :  { %v1010_v47 = vpop.permute.xlu1 %1009 }
 0x6f9   :  { %v1060_v52 = vpop.permute.xlu1 %1059 }
 0x6fa   :  { %v1617_v23 = vpop.eup %1616  ;;  %v1065_v54 = vsel %vm351_vm2, %v1060_v52, 0 }
 0x6fb   :  { %v897_v28 = vsel %vm351_vm2, %v1617_v23, 0.0 }
 0x6fc   :  { %v1619_v39 = vpop.eup %1618  ;;  %898 = vadd.xlane.f32.xlu0 %v897_v28 }
 0x6fd   :  { %v900_v35 = vsel %vm351_vm2, %v1619_v39, 0.0  ;;  %v1058_v56 = vpop.permute.xlu1 %1057 }
 0x700   :  { %901 = vadd.xlane.f32.xlu0 %v900_v35  ;;  %v1598_v35 = vld [vmem:[#allocation11] sm:$0xff]  }
 0x716   :  { %909 = vrot.lane.b32.xlu0 %v2045_v43, %s1809_s9 }
 0x71a   :  { %1007 = vrot.lane.b32.xlu0 %v2029_v33, %s1810_s25  ;;  %v1015_v33 = vsel %vm351_vm2, %v1010_v47, 0 }
 0x789   :  { %v899_v40 = vpop.xlane.xlu0 %898 }
 0x78a   :  { %1620 = vrcp.f32 %v899_v40  ;;  %v1599_v40 = vld [vmem:[#allocation11 + $0x8] sm:$0xff]  }
 0x78d   :  { %v902_v41 = vpop.xlane.xlu0 %901 }
 0x78e   :  { %1622 = vrcp.f32 %v902_v41 }
 0x791   :  { %v910_v42 = vpop.permute.xlu0 %909 }
 0x792   :  { %v915_v45 = vsel %vm471_vm3, %v910_v42, 0 }
 0x793   :  { %1531 = vmatpush3.bf16.msra.mxu1 %v915_v45 }
 0x794   :  { %v1621_v46 = vpop.eup %1620  ;;  %1542 = vmatprep.subr.bf16.mxu1 %v1806_v0 }
 0x795   :  { %v905_v48 = vmul.f32 %v1621_v46, %v1617_v23  ;;  %v1008_v55 = vpop.permute.xlu0 %1007 }
 0x797   :  { %v907_v49 = vpack.c.bf16 %v905_v48, %v905_v48 }
 0x798   :  { %v1623_v50 = vpop.eup %1622 }
 0x799   :  { %v906_v51 = vmul.f32 %v1623_v50, %v1619_v39  ;;  %1533 = vmatmul.mubr.msk.bf16.vlgmr.msra.gmra.mrb[24].mxu1 %vm351_vm2, %v907_v49 }
 0x79a   :  { %1544 = vmatprep.mubr.msk.bf16.mxu1 %vm1807_vm0, %v1806_v0 }
 0x79b   :  { %v908_v53 = vpack.c.bf16 %v906_v51, %v906_v51 }
 0x79c   :  { %1543 = vmatpush3.bf16.xpose.msra.mxu1 %v1015_v33 }
 0x79d   :  { %1539 = vmatmul.mubr.msk.bf16.vlgmr.msra.gmra.mrb[28].mxu0 %vm351_vm2, %v908_v53  ;;  %1554 = vmatprep.subr.bf16.mxu1 %v1806_v0 }
 0x79e   :  { %1549 = vmatpush3.bf16.xpose.msra.mxu0 %v1065_v54  ;;  %1550 = vmatprep.mubr.msk.bf16.mxu0 %vm1807_vm0, %v1806_v0 }
 0x79f   :  { %1560 = vmatprep.subr.bf16.mxu0 %v1806_v0 }
 0x7a3   :  { %1545 = vmatmul.mubr.msk.bf16.vlgmr.msra.gmra.mrb[28].mxu1 %vm351_vm2, %v1008_v55 }
 0x7a4   :  { %1556 = vmatprep.mubr.msk.bf16.mxu1 %vm1807_vm0, %v1806_v0 }
 0x7a5   :  { %1551 = vmatmul.mubr.msk.bf16.vlgmr.msra.gmra.mrb[32].mxu0 %vm351_vm2, %v1058_v56  ;;  %v562_v56 = vpack.c.bf16 %v2083_v22, %v2083_v22 }
 0x7a6   :  { %1562 = vmatprep.mubr.msk.bf16.mxu0 %vm1807_vm0, %v1806_v0 }
 0x86c   :  { %v951_v57 = vpop.f32.mrb[24].mxu1 }
 0x86d   :  { %v1534_v58 = vpop.f32.mrb[25].mxu1  ;;  %v1005_v30 = vpack.c.bf16 %v951_v57, %v951_v57 }
 0x86e   :  { %v954_v59 = vpop.f32.mrb[26].mxu1 }
 0x86f   :  { %v1535_v60 = vpop.f32.mrb[27].mxu1 }
 0x870   :  { %v999_v61 = vpop.f32.mrb[28].mxu0 }
 0x871   :  { %v1540_v62 = vpop.f32.mrb[29].mxu0  ;;  %v1006_v16 = vpack.c.bf16 %v999_v61, %v999_v61 }
 0x872   :  { %v1002_v63 = vpop.f32.mrb[30].mxu0 }
 0x873   :  { %v1541_v1 = vpop.f32.mrb[31].mxu0 }
 0x876   :  { %v1051_v2 = vpop.f32.mrb[28].mxu1 }
 0x877   :  { %v1546_v3 = vpop.f32.mrb[29].mxu1  ;;  %v1107_v4 = vsel %vm351_vm2, %v1051_v2, -inf }
 0x878   :  { %1108 = vmax.xlane.f32.xlu0 %v1107_v4  ;;  %v1054_v5 = vpop.f32.mrb[30].mxu1  ;;  %v1101_v6 = vpop.f32.mrb[32].mxu0 }
 0x879   :  { %v1547_v8 = vpop.f32.mrb[31].mxu1  ;;  %v1552_v9 = vpop.f32.mrb[33].mxu0  ;;  %v1110_v10 = vsel %vm351_vm2, %v1101_v6, -inf }
 0x87a   :  { %1111 = vmax.xlane.f32.xlu1 %v1110_v10  ;;  %v1104_v12 = vpop.f32.mrb[34].mxu0 }
 0x87b   :  { %v1553_v13 = vpop.f32.mrb[35].mxu0 }
 0x88b   :  { %1179 = vrot.lane.b32.xlu1 %v2047_v44, %s1810_s25 }
 0x88f   :  { %1231 = vrot.lane.b32.xlu1 %v783_v14, %s1799_s30 }
 0x893   :  { %1233 = vrot.lane.b32.xlu1 %v784_v15, %s1799_s30 }
 0x897   :  { %1239 = vrot.lane.b32.xlu1 %v1006_v16, %s1811_s26 }
 0x905   :  { %v1109_v17 = vpop.xlane.xlu0 %1108 }
 0x906   :  { %v1113_v19 = vsub.f32 %v1051_v2, %v1109_v17 }
 0x907   :  { %v1112_v20 = vpop.xlane.xlu1 %1111 }
 0x908   :  { %v1115_v21 = vmul.f32 1.442695, %v1113_v19  ;;  %v1114_v24 = vsub.f32 %v1101_v6, %v1112_v20 }
 0x90a   :  { %1624 = vpow2.f32 %v1115_v21  ;;  %v1117_v44 = vmul.f32 1.442695, %v1114_v24 }
 0x90b   :  { %v1180_v25 = vpop.permute.xlu1 %1179 }
 0x90c   :  { %1626 = vpow2.f32 %v1117_v44  ;;  %v1185_v7 = vsel %vm471_vm3, %v1180_v25, 0 }
 0x90d   :  { %1561 = vmatpush3.bf16.msra.mxu0 %v1185_v7 }
 0x90f   :  { %v1232_v33 = vpop.permute.xlu1 %1231 }
 0x913   :  { %v1234_v53 = vpop.permute.xlu1 %1233 }
 0x914   :  { %v1625_v26 = vpop.eup %1624  ;;  %v1252_v59 = vsel %vm351_vm2, %v562_v56, %v1234_v53 }
 0x915   :  { %v1119_v11 = vsel %vm351_vm2, %v1625_v26, 0.0 }
 0x916   :  { %v1627_v27 = vpop.eup %1626  ;;  %1120 = vadd.xlane.f32.xlu0 %v1119_v11 }
 0x917   :  { %v1122_v29 = vsel %vm351_vm2, %v1627_v27, 0.0  ;;  %v1240_v55 = vpop.permute.xlu1 %1239 }
 0x918   :  { %v1257_v60 = vsel %vm1253_vm4, %v1252_v59, %v1240_v55 }
 0x91a   :  { %1123 = vadd.xlane.f32.xlu0 %v1122_v29 }
 0x930   :  { %1131 = vrot.lane.b32.xlu0 %v2045_v43, %s1810_s25 }
 0x934   :  { %1237 = vrot.lane.b32.xlu0 %v1005_v30, %s1811_s26 }
 0x9a3   :  { %v1121_v31 = vpop.xlane.xlu0 %1120 }
 0x9a4   :  { %1628 = vrcp.f32 %v1121_v31 }
 0x9a7   :  { %v1124_v32 = vpop.xlane.xlu0 %1123 }
 0x9a8   :  { %1630 = vrcp.f32 %v1124_v32 }
 0x9ab   :  { %v1132_v34 = vpop.permute.xlu0 %1131 }
 0x9ac   :  { %v1137_v36 = vsel %vm471_vm3, %v1132_v34, 0 }
 0x9ad   :  { %1555 = vmatpush3.bf16.msra.mxu1 %v1137_v36 }
 0x9ae   :  { %v1629_v37 = vpop.eup %1628  ;;  %1566 = vmatprep.subr.bf16.mxu1 %v1806_v0 }
 0x9af   :  { %v1127_v38 = vmul.f32 %v1629_v37, %v1625_v26  ;;  %v1238_v54 = vpop.permute.xlu0 %1237 }
 0x9b1   :  { %v1129_v23 = vpack.c.bf16 %v1127_v38, %v1127_v38 }
 0x9b2   :  { %v1631_v28 = vpop.eup %1630 }
 0x9b3   :  { %v1128_v39 = vmul.f32 %v1631_v28, %v1627_v27  ;;  %1557 = vmatmul.mubr.msk.bf16.vlgmr.msra.gmra.mrb[32].mxu1 %vm351_vm2, %v1129_v23 }
 0x9b4   :  { %1570 = vmatprep.mubr.msk.bf16.mxu1 %vm1807_vm0, %v1806_v0  ;;  %1567 = vmatpush3.bf16.msra.mxu1 %v1598_v35 }
 0x9b5   :  { %v1130_v43 = vpack.c.bf16 %v1128_v39, %v1128_v39  ;;  %1568 = vmatprep.subr.bf16.mxu1 %v1806_v0  ;;  %v561_v0 = vpack.c.bf16 %v2081_v18, %v2081_v18  ;;  %v1391_v18 = vld [vmem:[%s2220_s10] ss:$0 sm:$0xff] }
 0x9b7   :  { %1563 = vmatmul.mubr.msk.bf16.vlgmr.msra.gmra.mrb[36].mxu0 %vm351_vm2, %v1130_v43  ;;  %v1249_v58 = vsel %vm351_vm2, %v561_v0, %v1232_v33 }
 0x9b8   :  { %1569 = vmatpush3.bf16.msra.mxu1 %v1599_v40  ;;  %v1255_v61 = vsel %vm1253_vm4, %v1249_v58, %v1238_v54 }
 0xa86   :  { %v1173_v41 = vpop.f32.mrb[32].mxu1 }
 0xa87   :  { %v1227_v42 = vpack.c.bf16 %v1173_v41, %v1173_v41  ;;  %v1558_v45 = vpop.f32.mrb[33].mxu1 }
 0xa88   :  { %v1176_v46 = vpop.f32.mrb[34].mxu1 }
 0xa89   :  { %1243 = vrot.lane.b32.xlu0 %v1227_v42, %s1812_s2  ;;  %v1559_v47 = vpop.f32.mrb[35].mxu1 }
 0xa8a   :  { %v1221_v48 = vpop.f32.mrb[36].mxu0 }
 0xa8b   :  { %v1228_v49 = vpack.c.bf16 %v1221_v48, %v1221_v48  ;;  %v1564_v50 = vpop.f32.mrb[37].mxu0 }
 0xa8c   :  { %v1224_v51 = vpop.f32.mrb[38].mxu0 }
 0xa8d   :  { %1245 = vrot.lane.b32.xlu1 %v1228_v49, %s1812_s2  ;;  %v1565_v52 = vpop.f32.mrb[39].mxu0 }
 0xafb   :  { %v1244_v57 = vpop.permute.xlu0 %1243 }
 0xafc   :  { %v1260_v63 = vsel %vm1258_vm5, %v1255_v61, %v1244_v57 }
 0xaff   :  { %v1246_v62 = vpop.permute.xlu1 %1245 }
 0xb00   :  { %v1262_v1 = vsel %vm1258_vm5, %v1257_v60, %v1246_v62 }
 0xb01   :  { %v1392_v2 = vcombine.low %v1260_v63, %v1262_v1 }
 0xb03   :  { %1571 = vmatmul.mubr.msk.bf16.vlgmr.msra.gmra.mrb[36].mxu1 %vm154_vm1, %v1392_v2 }
 0xbd6   :  { %v1328_v22 = vpop.f32.mrb[36].mxu1 }
 0xbd7   :  { %v1329_v3 = vadd.f32 %v1391_v18, %v1328_v22  ;;  %v1572_v4 = vpop.f32.mrb[37].mxu1 }
 0xbd8   :  { %v1331_v5 = vpop.f32.mrb[38].mxu1 }
 0xbd9   :  { %1335 = vst.msk [vmem:[#allocation13] sm:$0xff] %vm154_vm1, %v1329_v3  ;;  %v1332_v6 = vadd.f32 %v1391_v18, %v1331_v5  ;;  %v1573_v8 = vpop.f32.mrb[39].mxu1 }
 0xbdb   :  { %1336 = vst.msk [vmem:[#allocation13 + $0x8] sm:$0xff] %vm154_vm1, %v1332_v6 }
 0xbdc   :  { %1775 = shalt.err (!%p1772_p10)
}
 0xbdd   :  { %s1776_s27 = scalar_lea.hbm %s2221_s11, 256 }
 0xbde   :  { %p1777_p11 = scmp.ne.s32.totalorder %s2221_s11, %s1776_s27  ;;  %p1780_p12 = scmp.lt.u32.totalorder %s1776_s27, %s2221_s11 }
 0xbe0   :  { %p1782_p13 = pnand %p1780_p12, %p1777_p11 }
 0xbe2   :  { %1785 = shalt.err (!%p1782_p13)
}
 0xbe3   :  { %1348 = dma.vmem_to_hbm [thread:$0]  %s1343_s14, 256, %s2221_s11, [#allocation4], %s1798_s29, %s1798_s29, %s1799_s30  }
 0xbe4   :  { %1794 = dma.done.wait [#allocation4], 256  }
 0xbe5   :  { %1795 = vsyncadd [#allocation4], 4294967040 }
 0xbe6   :  { %1352 = vsyncpa [#allocation3], 1 }
 0xbe7   :  { %1353 = vsyncpa [#allocation6], 1 }
 0xbe8   :  { %1354 = vsyncpa [#allocation9], 1 }
 0xbe9   :  { %1355 = vsyncpa [#allocation12], 1 }
 0xbea   :  { %1356 = vsyncpa [#allocation4], 1 }

</bundles_post_ra>
